<compile_context>
chip_gen: v5e
topology: v5e:2x2
jax: 0.10.0
libtpu: 0.0.40
codegen_flags: <defaults>
</compile_context>

<pallas_src>
import functools
import numpy as np

import jax
import jax.numpy as jnp
from jax.experimental import pallas as pl
from jax.experimental.pallas import tpu as pltpu

KSIZE = 3
EPS = 1e-5

MIN_GRID_STEPS = 8        # >= 4 pipelined steps per TensorCore on v7x, 8 on v5e/v6e
MAX_ROWS_PER_STEP = 512   # keep per-step live ranges small (no VMEM spills)


# ----------------------------------------------------------------------------
# Module configuration helpers (mirrors the PyTorch __init__)
# ----------------------------------------------------------------------------
def filterset_to_levels(target):
    cur = 1
    atoms = [8]
    while int(np.sum(atoms)) < target:
        new_atoms = atoms[-1] * 2
        if int(np.sum(atoms)) + new_atoms < target:
            cur += 1
            atoms.append(new_atoms)
            continue
        else:
            diff_below = abs(int(np.sum(atoms)) - target)
            diff_above = abs(int(np.sum(atoms)) + new_atoms - target)
            if diff_below <= diff_above:
                break
            else:
                cur += 1
                atoms.append(new_atoms)
                break
    return cur, atoms


def init_params(key, in_dim, out_dim, atoms):
    """Deterministic synthetic weights (shapes follow the PyTorch module)."""
    c9 = in_dim * KSIZE * KSIZE
    a_total = int(np.sum(atoms))
    ks = jax.random.split(key, 6)
    s = 0.1
    return dict(
        # encoder: per-level Conv2d(in_dim, atoms[l], 3) flattened+concatenated
        # into a single (C*9, sum(atoms)) matmul weight.
        w_enc=s * jax.random.normal(ks[0], (c9, a_total), jnp.float32),
        b_enc=s * jax.random.normal(ks[1], (1, a_total), jnp.float32),
        # decoder: Conv2d(sum(atoms), in_dim*9, 1)
        w_dec=s * jax.random.normal(ks[2], (a_total, c9), jnp.float32),
        b_dec=s * jax.random.normal(ks[3], (1, c9), jnp.float32),
        # reducer: Conv2d(sum(atoms), out_dim, 1)
        w_red=s * jax.random.normal(ks[4], (a_total, out_dim), jnp.float32),
        b_red=s * jax.random.normal(ks[5], (1, out_dim), jnp.float32),
    )


# ----------------------------------------------------------------------------
# Pallas kernel: in-kernel im2col + encoder conv + per-level top-k +
# decoder/reducer 1x1 convs + per-channel aux statistics (accumulated in the
# VMEM-resident stats output block, so aux never round-trips through HBM).
# ----------------------------------------------------------------------------
def _fused_kernel(xg_ref, vmask_ref, wenc_ref, benc_ref, wdec_ref, bdec_ref,
                  wred_ref, bred_ref, y_ref, stat_ref, *,
                  atoms, k, th, w_img, cin):
    c9 = cin * KSIZE * KSIZE
    rows = th * w_img                      # output "pixels" per step (incl. junk cols)

    # ---- in-kernel im2col on the flat (row-major spatial) layout -----------
    # Patch column block (kh, kw) is a static sublane-offset slice of the
    # halo'd flat row block; no reshapes needed anywhere in the kernel.
    xb = xg_ref[0]                                         # (th_in*W + 2, C) f32
    pieces = []
    for kh in range(KSIZE):
        for kw in range(KSIZE):
            s0 = kh * w_img + kw
            pieces.append(xb[s0:s0 + rows, :])             # (rows, C)
    p = jnp.concatenate(pieces, axis=-1)                   # (rows, C*9) f32

    # ---- encoder 3x3 conv as a matmul (bf16 MXU operands, f32 accumulate) --
    z = jnp.dot(p.astype(jnp.bfloat16), wenc_ref[...],
                preferred_element_type=jnp.float32) + benc_ref[...]   # (rows, A)

    # ---- per-level top-k over channels: full-width masked max/select -------
    # TODO(synk): ties at/below the running max are all masked each iteration,
    # so duplicated activation values can keep more than k entries (torch.topk
    # keeps exactly k); exact for distinct values, which is the generic case.
    a_total = z.shape[-1]
    col = jax.lax.broadcasted_iota(jnp.int32, (1, a_total), 1)
    neg = jnp.float32(-jnp.inf)
    keep = jnp.zeros(z.shape, jnp.bool_)
    off = 0
    for a in atoms:
        lvl = (col >= off) & (col < off + a)               # (1, A) level mask
        work = jnp.where(lvl, z, neg)
        thr = jnp.full((rows, 1), neg, jnp.float32)
        for _ in range(min(k, a)):                         # k small & static
            thr = jnp.max(work, axis=-1, keepdims=True)
            work = jnp.where(work >= thr, neg, work)
        keep = keep | (lvl & (z >= thr))
        off += a
    sparse = jnp.where(keep, z, 0.0)                       # (rows, A)

    # ---- decoder (1x1) + reducer (1x1) as two small matmuls ----------------
    # The decoder output (aux) never leaves VMEM: it only feeds the stats.
    sp = sparse.astype(jnp.bfloat16)
    aux = jnp.dot(sp, wdec_ref[...],
                  preferred_element_type=jnp.float32) + bdec_ref[...]   # (rows, c9)
    yred = jnp.dot(sp, wred_ref[...],
                   preferred_element_type=jnp.float32) + bred_ref[...]  # (rows, od)

    # main output: reducer activations only (dense small per-group block).
    y_ref[0] = yred.astype(y_ref.dtype)

    # ---- aux statistics via MXU masked-ones matmuls ------------------------
    # lmask row 0 is the per-row validity mask (invalid = out-of-image junk
    # columns / rows), rows 1..7 are zero -> no separate masking of p / aux.
    lmask = vmask_ref[0]                                   # (8, rows) f32
    s_t = jnp.dot(lmask, p, preferred_element_type=jnp.float32)
    s_tt = jnp.dot(lmask, p * p, preferred_element_type=jnp.float32)
    s_a = jnp.dot(lmask, aux, preferred_element_type=jnp.float32)
    s_aa = jnp.dot(lmask, aux * aux, preferred_element_type=jnp.float32)
    s_ta = jnp.dot(lmask, p * aux, preferred_element_type=jnp.float32)
    step_stats = jnp.concatenate(
        [s_t[0:1], s_tt[0:1], s_a[0:1], s_aa[0:1], s_ta[0:1],
         jnp.zeros((3, c9), jnp.float32)], axis=0)         # (8, c9)

    # Accumulate in the VMEM-resident stats output block across the inner
    # ("arbitrary") grid axis; written back to HBM once per outer index.
    i = pl.program_id(1)

    @pl.when(i == 0)
    def _():
        stat_ref[...] = jnp.zeros_like(stat_ref)

    stat_ref[...] += step_stats[None]


# ----------------------------------------------------------------------------
# Forward wrapper
# ----------------------------------------------------------------------------
def _block_vmem_bytes(shape, dtype_bytes):
    s = list(shape)
    if len(s) >= 1:
        s[-1] = -(-s[-1] // 128) * 128
    if len(s) >= 2:
        s[-2] = -(-s[-2] // 8) * 8
    return int(np.prod(s)) * dtype_bytes


def forward(params, x, *, k, atoms, padding=0, stride=1):
    assert padding == 0 and stride == 1, "TODO(synk): only the stride=1/padding=0 path"
    b, cin, h, w = x.shape
    c9 = cin * KSIZE * KSIZE
    a_total = int(np.sum(atoms))
    out_dim = params["w_red"].shape[1]

    ho = (h - KSIZE) // stride + 1
    wo = (w - KSIZE) // stride + 1
    m = b * ho * wo

    # self.bn(x): BatchNorm2d in training mode (batch stats, gamma=1, beta=0).
    mean = jnp.mean(x, axis=(0, 2, 3), keepdims=True)
    var = jnp.mean((x - mean) ** 2, axis=(0, 2, 3), keepdims=True)
    xbn = (x - mean) * jax.lax.rsqrt(var + EPS)
    x_flat = jnp.transpose(xbn, (0, 2, 3, 1)).reshape(b, h * w, cin)   # (B, H*W, C)

    # Row-group tiling: each grid step gets a halo'd flat row block of
    # th+2 input image rows (plus KSIZE-1 trailing elements for the kw shift).
    n_chunks = max(int(np.ceil(MIN_GRID_STEPS / b)),
                   int(np.ceil(ho / max(1, MAX_ROWS_PER_STEP // w))))
    n_chunks = min(n_chunks, ho)
    th = int(np.ceil(ho / n_chunks))
    n_chunks = int(np.ceil(ho / th))
    th_in = th + KSIZE - 1
    g_total = b * n_chunks
    rows = th * w
    blk_len = th_in * w + (KSIZE - 1)

    # Halo'd input row blocks, gathered once (~(th+2)/th duplication vs. 9x
    # for an HBM patch matrix); indices clamped for the last chunk.
    starts = np.arange(n_chunks) * th * w
    idx = np.minimum(starts[:, None] + np.arange(blk_len)[None, :], h * w - 1)
    xg = jnp.take(x_flat, jnp.asarray(idx, np.int32), axis=1)   # (B, nc, L, C)
    xg = xg.reshape(g_total, blk_len, cin)

    # Per-chunk validity mask (row 0 of the stats-matmul LHS); rows 1..7 zero.
    vm = np.zeros((n_chunks, 8, rows), np.float32)
    jj = np.arange(rows)
    for r in range(n_chunks):
        valid = ((jj % w) < wo) & ((r * th + jj // w) < ho)
        vm[r, 0, :] = valid.astype(np.float32)
    vmask = jnp.asarray(vm)

    # 2-D grid: outer axis "parallel" (megacore sharding on v7x), inner axis
    # "arbitrary" (4+ pipelined steps per core; stats accumulate across it).
    if g_total % 2 == 0:
        n_outer, n_inner = 2, g_total // 2
    else:
        n_outer, n_inner = 1, g_total

    w_enc = params["w_enc"].astype(jnp.bfloat16)
    w_dec = params["w_dec"].astype(jnp.bfloat16)
    w_red = params["w_red"].astype(jnp.bfloat16)

    # Explicit VMEM budget: grid-indexed blocks double-buffered, constant-index
    # weights single-buffered; 2x margin for compute temporaries plus a fixed
    # Mosaic-scratch allowance, capped below v7x's 64 MiB per-TC VMEM.
    vmem_est = (
        2 * _block_vmem_bytes((1, blk_len, cin), 4)        # xg block
        + 2 * _block_vmem_bytes((1, 8, rows), 4)           # vmask block
        + 2 * _block_vmem_bytes((1, rows, out_dim), 4)     # y block
        + 2 * _block_vmem_bytes((1, 8, c9), 4)             # stats block
        + _block_vmem_bytes((c9, a_total), 2)
        + _block_vmem_bytes((a_total, c9), 2)
        + _block_vmem_bytes((a_total, out_dim), 2)
        + _block_vmem_bytes((1, a_total), 4)
        + _block_vmem_bytes((1, c9), 4)
        + _block_vmem_bytes((1, out_dim), 4))
    vmem_limit = int(min(2 * vmem_est + (8 << 20), 48 << 20))

    kern = functools.partial(
        _fused_kernel, atoms=tuple(int(a) for a in atoms), k=int(k),
        th=th, w_img=w, cin=cin)

    yg, stats = pl.pallas_call(
        kern,
        out_shape=(jax.ShapeDtypeStruct((g_total, rows, out_dim), jnp.float32),
                   jax.ShapeDtypeStruct((n_outer, 8, c9), jnp.float32)),
        grid=(n_outer, n_inner),
        in_specs=[
            pl.BlockSpec((1, blk_len, cin),
                         lambda o, i: (o * n_inner + i, 0, 0)),          # xg
            pl.BlockSpec((1, 8, rows),
                         lambda o, i: ((o * n_inner + i) % n_chunks, 0, 0)),  # mask
            pl.BlockSpec((c9, a_total), lambda o, i: (0, 0)),            # w_enc
            pl.BlockSpec((1, a_total), lambda o, i: (0, 0)),             # b_enc
            pl.BlockSpec((a_total, c9), lambda o, i: (0, 0)),            # w_dec
            pl.BlockSpec((1, c9), lambda o, i: (0, 0)),                  # b_dec
            pl.BlockSpec((a_total, out_dim), lambda o, i: (0, 0)),       # w_red
            pl.BlockSpec((1, out_dim), lambda o, i: (0, 0)),             # b_red
        ],
        out_specs=(
            pl.BlockSpec((1, rows, out_dim),
                         lambda o, i: (o * n_inner + i, 0, 0)),          # y
            pl.BlockSpec((1, 8, c9), lambda o, i: (o, 0, 0)),            # stats
        ),
        compiler_params=pltpu.CompilerParams(
            dimension_semantics=("parallel", "arbitrary"),
            vmem_limit_bytes=vmem_limit),
    )(xg, vmask, w_enc, params["b_enc"], w_dec, params["b_dec"],
      w_red, params["b_red"])

    # main output: reducer(encoder(bn(x))), reassembled to NCHW.
    y = yg.reshape(b, n_chunks, th, w, out_dim)
    y = y.reshape(b, n_chunks * th, w, out_dim)[:, :ho, :wo]
    y = jnp.transpose(y, (0, 3, 1, 2))                     # (B, out_dim, Ho, Wo)

    # aux_bn (training mode) + MSE loss in closed form from the per-channel
    # partial sums: the decoder output never round-trips through HBM.
    st = jnp.sum(stats, axis=0)                            # (8, c9)
    s_t, s_tt, s_a, s_aa, s_ta = st[0], st[1], st[2], st[3], st[4]
    n = float(m)
    mean_a = s_a / n
    var_a = jnp.maximum(s_aa / n - mean_a * mean_a, 0.0)   # biased batch var
    inv = jax.lax.rsqrt(var_a + EPS)
    # TODO(synk): the closed-form expansion (E[a^2]-E[a]^2 style) is
    # cancellation-prone vs. a two-pass MSE when |mean(aux)| >> std(aux);
    # kept in f32 as the price of full fusion.
    per_ch = s_tt - 2.0 * inv * (s_ta - mean_a * s_t) + n * var_a * inv * inv
    aux_loss = jnp.sum(per_ch) / (n * c9)
    return y, aux_loss


# ----------------------------------------------------------------------------
if __name__ == "__main__":
    in_dim, out_dim, filterset_size, k = 4, 8, 24, 2
    levels, atoms = filterset_to_levels(filterset_size)   # -> levels=2, [8, 16]

    key = jax.random.PRNGKey(0)
    kx, kp = jax.random.split(key)
    x = jax.random.normal(kx, (2, in_dim, 16, 16), jnp.float32)   # NCHW input
    params = init_params(kp, in_dim, out_dim, atoms)

    fwd = jax.jit(functools.partial(forward, k=k, atoms=tuple(atoms)))
    y, aux_loss = fwd(params, x)
    jax.block_until_ready((y, aux_loss))

    assert y.shape == (2, out_dim, 14, 14)
    assert aux_loss.shape == ()
    assert bool(jnp.isfinite(aux_loss)) and bool(jnp.all(jnp.isfinite(y)))
    print("KERNEL_OK")
</pallas_src>

<mosaic_0001>
module attributes {stable_mosaic.version = 11 : i64} {
  func.func @_fused_kernel(%arg0: i32, %arg1: i32, %arg2: memref<1x98x4xf32, #tpu.memory_space<vmem>>, %arg3: memref<1x8x64xf32, #tpu.memory_space<vmem>>, %arg4: memref<36x24xbf16, #tpu.memory_space<vmem>>, %arg5: memref<1x24xf32, #tpu.memory_space<vmem>>, %arg6: memref<24x36xbf16, #tpu.memory_space<vmem>>, %arg7: memref<1x36xf32, #tpu.memory_space<vmem>>, %arg8: memref<24x8xbf16, #tpu.memory_space<vmem>>, %arg9: memref<1x8xf32, #tpu.memory_space<vmem>>, %arg10: memref<1x64x8xf32, #tpu.memory_space<vmem>>, %arg11: memref<1x8x36xf32, #tpu.memory_space<vmem>>) attributes {dimension_semantics = [#tpu.dimension_semantics<parallel>, #tpu.dimension_semantics<arbitrary>], iteration_bounds = array<i64: 2, 4>, scalar_prefetch = 0 : i64, scratch_operands = 0 : i64, tpu.core_type = #tpu.core_type<tc>, window_params = [{transform_indices = @transform_0, window_bounds = array<i64: 1, 98, 4>}, {transform_indices = @transform_1, window_bounds = array<i64: 1, 8, 64>}, {pipeline_mode = #tpu.pipeline_mode<synchronous>, transform_indices = @transform_2, window_bounds = array<i64: 36, 24>}, {pipeline_mode = #tpu.pipeline_mode<synchronous>, transform_indices = @transform_3, window_bounds = array<i64: 1, 24>}, {pipeline_mode = #tpu.pipeline_mode<synchronous>, transform_indices = @transform_4, window_bounds = array<i64: 24, 36>}, {pipeline_mode = #tpu.pipeline_mode<synchronous>, transform_indices = @transform_5, window_bounds = array<i64: 1, 36>}, {pipeline_mode = #tpu.pipeline_mode<synchronous>, transform_indices = @transform_6, window_bounds = array<i64: 24, 8>}, {pipeline_mode = #tpu.pipeline_mode<synchronous>, transform_indices = @transform_7, window_bounds = array<i64: 1, 8>}, {transform_indices = @transform_8, window_bounds = array<i64: 1, 64, 8>}, {transform_indices = @transform_9, window_bounds = array<i64: 1, 8, 36>}]} {
    %c0 = arith.constant 0 : index
    %c0_0 = arith.constant 0 : index
    %c0_1 = arith.constant 0 : index
    %0 = vector.load %arg2[%c0, %c0_0, %c0_1] : memref<1x98x4xf32, #tpu.memory_space<vmem>>, vector<1x98x4xf32>
    %1 = vector.shape_cast %0 : vector<1x98x4xf32> to vector<98x4xf32>
    %2 = vector.extract_strided_slice %1 {offsets = [0, 0], sizes = [64, 4], strides = [1, 1]} : vector<98x4xf32> to vector<64x4xf32>
    %3 = vector.extract_strided_slice %1 {offsets = [1, 0], sizes = [64, 4], strides = [1, 1]} : vector<98x4xf32> to vector<64x4xf32>
    %4 = vector.extract_strided_slice %1 {offsets = [2, 0], sizes = [64, 4], strides = [1, 1]} : vector<98x4xf32> to vector<64x4xf32>
    %5 = vector.extract_strided_slice %1 {offsets = [16, 0], sizes = [64, 4], strides = [1, 1]} : vector<98x4xf32> to vector<64x4xf32>
    %6 = vector.extract_strided_slice %1 {offsets = [17, 0], sizes = [64, 4], strides = [1, 1]} : vector<98x4xf32> to vector<64x4xf32>
    %7 = vector.extract_strided_slice %1 {offsets = [18, 0], sizes = [64, 4], strides = [1, 1]} : vector<98x4xf32> to vector<64x4xf32>
    %8 = vector.extract_strided_slice %1 {offsets = [32, 0], sizes = [64, 4], strides = [1, 1]} : vector<98x4xf32> to vector<64x4xf32>
    %9 = vector.extract_strided_slice %1 {offsets = [33, 0], sizes = [64, 4], strides = [1, 1]} : vector<98x4xf32> to vector<64x4xf32>
    %10 = vector.extract_strided_slice %1 {offsets = [34, 0], sizes = [64, 4], strides = [1, 1]} : vector<98x4xf32> to vector<64x4xf32>
    %11 = tpu.concatenate %2, %3, %4, %5, %6, %7, %8, %9, %10 in 1 : vector<64x4xf32>, vector<64x4xf32>, vector<64x4xf32>, vector<64x4xf32>, vector<64x4xf32>, vector<64x4xf32>, vector<64x4xf32>, vector<64x4xf32>, vector<64x4xf32> -> vector<64x36xf32>
    %12 = arith.truncf %11 : vector<64x36xf32> to vector<64x36xbf16>
    %c0_2 = arith.constant 0 : index
    %c0_3 = arith.constant 0 : index
    %13 = vector.load %arg4[%c0_2, %c0_3] : memref<36x24xbf16, #tpu.memory_space<vmem>>, vector<36x24xbf16>
    %cst = arith.constant dense<0.000000e+00> : vector<64x24xf32>
    %14 = tpu.matmul %12, %13, %cst {dimension_numbers = #tpu.dot_dimension_numbers<[1], [0], [0], [1], [0, 0, 1, 1], [], []>} : vector<64x36xbf16>, vector<36x24xbf16>, vector<64x24xf32> -> vector<64x24xf32>
    %c0_4 = arith.constant 0 : index
    %c0_5 = arith.constant 0 : index
    %15 = vector.load %arg5[%c0_4, %c0_5] : memref<1x24xf32, #tpu.memory_space<vmem>>, vector<1x24xf32>
    %16 = vector.broadcast %15 : vector<1x24xf32> to vector<64x24xf32>
    %17 = arith.addf %14, %16 : vector<64x24xf32>
    %18 = tpu.iota {dimensions = array<i32: 1>} : vector<1x24xi32>
    %false = arith.constant false
    %19 = vector.broadcast %false : i1 to vector<64x24xi1>
    %c0_i32 = arith.constant 0 : i32
    %20 = vector.broadcast %c0_i32 : i32 to vector<1x24xi32>
    %21 = arith.cmpi sge, %18, %20 : vector<1x24xi32>
    %c8_i32 = arith.constant 8 : i32
    %22 = vector.broadcast %c8_i32 : i32 to vector<1x24xi32>
    %23 = arith.cmpi slt, %18, %22 : vector<1x24xi32>
    %24 = arith.andi %21, %23 : vector<1x24xi1>
    %cst_6 = arith.constant 0xFF800000 : f32
    %25 = vector.shape_cast %24 : vector<1x24xi1> to vector<1x24xi1>
    %26 = vector.broadcast %25 : vector<1x24xi1> to vector<64x24xi1>
    %27 = vector.broadcast %cst_6 : f32 to vector<64x24xf32>
    %28 = arith.select %26, %17, %27 : vector<64x24xi1>, vector<64x24xf32>
    %cst_7 = arith.constant dense<0xFF800000> : vector<64xf32>
    %29 = vector.multi_reduction <maximumf>, %28, %cst_7 [1] : vector<64x24xf32> to vector<64xf32>
    %30 = vector.shape_cast %29 : vector<64xf32> to vector<64x1xf32>
    %31 = vector.broadcast %30 : vector<64x1xf32> to vector<64x24xf32>
    %32 = arith.cmpf oge, %28, %31 : vector<64x24xf32>
    %cst_8 = arith.constant 0xFF800000 : f32
    %33 = vector.broadcast %cst_8 : f32 to vector<64x24xf32>
    %34 = arith.select %32, %33, %28 : vector<64x24xi1>, vector<64x24xf32>
    %cst_9 = arith.constant dense<0xFF800000> : vector<64xf32>
    %35 = vector.multi_reduction <maximumf>, %34, %cst_9 [1] : vector<64x24xf32> to vector<64xf32>
    %36 = vector.shape_cast %35 : vector<64xf32> to vector<64x1xf32>
    %37 = vector.broadcast %36 : vector<64x1xf32> to vector<64x24xf32>
    %38 = arith.cmpf oge, %17, %37 : vector<64x24xf32>
    %39 = vector.broadcast %24 : vector<1x24xi1> to vector<64x24xi1>
    %40 = arith.andi %39, %38 : vector<64x24xi1>
    %41 = arith.ori %19, %40 : vector<64x24xi1>
    %c8_i32_10 = arith.constant 8 : i32
    %42 = vector.broadcast %c8_i32_10 : i32 to vector<1x24xi32>
    %43 = arith.cmpi sge, %18, %42 : vector<1x24xi32>
    %c24_i32 = arith.constant 24 : i32
    %44 = vector.broadcast %c24_i32 : i32 to vector<1x24xi32>
    %45 = arith.cmpi slt, %18, %44 : vector<1x24xi32>
    %46 = arith.andi %43, %45 : vector<1x24xi1>
    %cst_11 = arith.constant 0xFF800000 : f32
    %47 = vector.shape_cast %46 : vector<1x24xi1> to vector<1x24xi1>
    %48 = vector.broadcast %47 : vector<1x24xi1> to vector<64x24xi1>
    %49 = vector.broadcast %cst_11 : f32 to vector<64x24xf32>
    %50 = arith.select %48, %17, %49 : vector<64x24xi1>, vector<64x24xf32>
    %cst_12 = arith.constant dense<0xFF800000> : vector<64xf32>
    %51 = vector.multi_reduction <maximumf>, %50, %cst_12 [1] : vector<64x24xf32> to vector<64xf32>
    %52 = vector.shape_cast %51 : vector<64xf32> to vector<64x1xf32>
    %53 = vector.broadcast %52 : vector<64x1xf32> to vector<64x24xf32>
    %54 = arith.cmpf oge, %50, %53 : vector<64x24xf32>
    %cst_13 = arith.constant 0xFF800000 : f32
    %55 = vector.broadcast %cst_13 : f32 to vector<64x24xf32>
    %56 = arith.select %54, %55, %50 : vector<64x24xi1>, vector<64x24xf32>
    %cst_14 = arith.constant dense<0xFF800000> : vector<64xf32>
    %57 = vector.multi_reduction <maximumf>, %56, %cst_14 [1] : vector<64x24xf32> to vector<64xf32>
    %58 = vector.shape_cast %57 : vector<64xf32> to vector<64x1xf32>
    %59 = vector.broadcast %58 : vector<64x1xf32> to vector<64x24xf32>
    %60 = arith.cmpf oge, %17, %59 : vector<64x24xf32>
    %61 = vector.broadcast %46 : vector<1x24xi1> to vector<64x24xi1>
    %62 = arith.andi %61, %60 : vector<64x24xi1>
    %63 = arith.ori %41, %62 : vector<64x24xi1>
    %cst_15 = arith.constant 0.000000e+00 : f32
    %64 = vector.broadcast %cst_15 : f32 to vector<64x24xf32>
    %65 = arith.select %63, %17, %64 : vector<64x24xi1>, vector<64x24xf32>
    %66 = arith.truncf %65 : vector<64x24xf32> to vector<64x24xbf16>
    %c0_16 = arith.constant 0 : index
    %c0_17 = arith.constant 0 : index
    %67 = vector.load %arg6[%c0_16, %c0_17] : memref<24x36xbf16, #tpu.memory_space<vmem>>, vector<24x36xbf16>
    %cst_18 = arith.constant dense<0.000000e+00> : vector<64x36xf32>
    %68 = tpu.matmul %66, %67, %cst_18 {dimension_numbers = #tpu.dot_dimension_numbers<[1], [0], [0], [1], [0, 0, 1, 1], [], []>} : vector<64x24xbf16>, vector<24x36xbf16>, vector<64x36xf32> -> vector<64x36xf32>
    %c0_19 = arith.constant 0 : index
    %c0_20 = arith.constant 0 : index
    %69 = vector.load %arg7[%c0_19, %c0_20] : memref<1x36xf32, #tpu.memory_space<vmem>>, vector<1x36xf32>
    %70 = vector.broadcast %69 : vector<1x36xf32> to vector<64x36xf32>
    %71 = arith.addf %68, %70 : vector<64x36xf32>
    %c0_21 = arith.constant 0 : index
    %c0_22 = arith.constant 0 : index
    %72 = vector.load %arg8[%c0_21, %c0_22] : memref<24x8xbf16, #tpu.memory_space<vmem>>, vector<24x8xbf16>
    %cst_23 = arith.constant dense<0.000000e+00> : vector<64x8xf32>
    %73 = tpu.matmul %66, %72, %cst_23 {dimension_numbers = #tpu.dot_dimension_numbers<[1], [0], [0], [1], [0, 0, 1, 1], [], []>} : vector<64x24xbf16>, vector<24x8xbf16>, vector<64x8xf32> -> vector<64x8xf32>
    %c0_24 = arith.constant 0 : index
    %c0_25 = arith.constant 0 : index
    %74 = vector.load %arg9[%c0_24, %c0_25] : memref<1x8xf32, #tpu.memory_space<vmem>>, vector<1x8xf32>
    %75 = vector.broadcast %74 : vector<1x8xf32> to vector<64x8xf32>
    %76 = arith.addf %73, %75 : vector<64x8xf32>
    %c0_26 = arith.constant 0 : index
    %c0_27 = arith.constant 0 : index
    %c0_28 = arith.constant 0 : index
    %77 = vector.load %arg10[%c0_26, %c0_27, %c0_28] : memref<1x64x8xf32, #tpu.memory_space<vmem>>, vector<1x64x8xf32>
    %78 = vector.shape_cast %77 : vector<1x64x8xf32> to vector<64x8xf32>
    %79 = vector.shape_cast %76 : vector<64x8xf32> to vector<1x64x8xf32>
    tpu.vector_store %arg10[%c0_26, %c0_27, %c0_28], %79 {strides = array<i32>} : memref<1x64x8xf32, #tpu.memory_space<vmem>>, vector<1x64x8xf32>,
    %c0_29 = arith.constant 0 : index
    %c0_30 = arith.constant 0 : index
    %c0_31 = arith.constant 0 : index
    %80 = vector.load %arg3[%c0_29, %c0_30, %c0_31] : memref<1x8x64xf32, #tpu.memory_space<vmem>>, vector<1x8x64xf32>
    %81 = vector.shape_cast %80 : vector<1x8x64xf32> to vector<8x64xf32>
    %cst_32 = arith.constant dense<0.000000e+00> : vector<8x36xf32>
    %82 = tpu.matmul %81, %11, %cst_32 {dimension_numbers = #tpu.dot_dimension_numbers<[1], [0], [0], [1], [0, 0, 1, 1], [], []>} : vector<8x64xf32>, vector<64x36xf32>, vector<8x36xf32> -> vector<8x36xf32>
    %83 = arith.mulf %11, %11 : vector<64x36xf32>
    %cst_33 = arith.constant dense<0.000000e+00> : vector<8x36xf32>
    %84 = tpu.matmul %81, %83, %cst_33 {dimension_numbers = #tpu.dot_dimension_numbers<[1], [0], [0], [1], [0, 0, 1, 1], [], []>} : vector<8x64xf32>, vector<64x36xf32>, vector<8x36xf32> -> vector<8x36xf32>
    %cst_34 = arith.constant dense<0.000000e+00> : vector<8x36xf32>
    %85 = tpu.matmul %81, %71, %cst_34 {dimension_numbers = #tpu.dot_dimension_numbers<[1], [0], [0], [1], [0, 0, 1, 1], [], []>} : vector<8x64xf32>, vector<64x36xf32>, vector<8x36xf32> -> vector<8x36xf32>
    %86 = arith.mulf %71, %71 : vector<64x36xf32>
    %cst_35 = arith.constant dense<0.000000e+00> : vector<8x36xf32>
    %87 = tpu.matmul %81, %86, %cst_35 {dimension_numbers = #tpu.dot_dimension_numbers<[1], [0], [0], [1], [0, 0, 1, 1], [], []>} : vector<8x64xf32>, vector<64x36xf32>, vector<8x36xf32> -> vector<8x36xf32>
    %88 = arith.mulf %11, %71 : vector<64x36xf32>
    %cst_36 = arith.constant dense<0.000000e+00> : vector<8x36xf32>
    %89 = tpu.matmul %81, %88, %cst_36 {dimension_numbers = #tpu.dot_dimension_numbers<[1], [0], [0], [1], [0, 0, 1, 1], [], []>} : vector<8x64xf32>, vector<64x36xf32>, vector<8x36xf32> -> vector<8x36xf32>
    %90 = vector.extract_strided_slice %82 {offsets = [0, 0], sizes = [1, 36], strides = [1, 1]} : vector<8x36xf32> to vector<1x36xf32>
    %91 = vector.extract_strided_slice %84 {offsets = [0, 0], sizes = [1, 36], strides = [1, 1]} : vector<8x36xf32> to vector<1x36xf32>
    %92 = vector.extract_strided_slice %85 {offsets = [0, 0], sizes = [1, 36], strides = [1, 1]} : vector<8x36xf32> to vector<1x36xf32>
    %93 = vector.extract_strided_slice %87 {offsets = [0, 0], sizes = [1, 36], strides = [1, 1]} : vector<8x36xf32> to vector<1x36xf32>
    %94 = vector.extract_strided_slice %89 {offsets = [0, 0], sizes = [1, 36], strides = [1, 1]} : vector<8x36xf32> to vector<1x36xf32>
    %cst_37 = arith.constant 0.000000e+00 : f32
    %95 = vector.broadcast %cst_37 : f32 to vector<3x36xf32>
    %96 = tpu.concatenate %90, %91, %92, %93, %94, %95 in 0 : vector<1x36xf32>, vector<1x36xf32>, vector<1x36xf32>, vector<1x36xf32>, vector<1x36xf32>, vector<3x36xf32> -> vector<8x36xf32>
    %c0_i32_38 = arith.constant 0 : i32
    %97 = arith.cmpi eq, %arg1, %c0_i32_38 : i32
    %98 = arith.extui %97 : i1 to i32
    %c0_i32_39 = arith.constant 0 : i32
    %99 = arith.cmpi ne, %98, %c0_i32_39 : i32
    scf.if %99 {
      %cst_46 = arith.constant 0.000000e+00 : f32
      %104 = vector.broadcast %cst_46 : f32 to vector<1x8x36xf32>
      %c0_47 = arith.constant 0 : index
      %c0_48 = arith.constant 0 : index
      %c0_49 = arith.constant 0 : index
      %105 = vector.load %arg11[%c0_47, %c0_48, %c0_49] : memref<1x8x36xf32, #tpu.memory_space<vmem>>, vector<1x8x36xf32>
      tpu.vector_store %arg11[%c0_47, %c0_48, %c0_49], %104 {strides = array<i32>} : memref<1x8x36xf32, #tpu.memory_space<vmem>>, vector<1x8x36xf32>,
    } else {
    }
    %c0_40 = arith.constant 0 : index
    %c0_41 = arith.constant 0 : index
    %c0_42 = arith.constant 0 : index
    %100 = vector.load %arg11[%c0_40, %c0_41, %c0_42] : memref<1x8x36xf32, #tpu.memory_space<vmem>>, vector<1x8x36xf32>
    %101 = vector.shape_cast %96 : vector<8x36xf32> to vector<1x8x36xf32>
    %102 = arith.addf %100, %101 : vector<1x8x36xf32>
    %c0_43 = arith.constant 0 : index
    %c0_44 = arith.constant 0 : index
    %c0_45 = arith.constant 0 : index
    %103 = vector.load %arg11[%c0_43, %c0_44, %c0_45] : memref<1x8x36xf32, #tpu.memory_space<vmem>>, vector<1x8x36xf32>
    tpu.vector_store %arg11[%c0_43, %c0_44, %c0_45], %102 {strides = array<i32>} : memref<1x8x36xf32, #tpu.memory_space<vmem>>, vector<1x8x36xf32>,
    return
  }
  func.func @transform_0(%arg0: i32, %arg1: i32) -> (i32, i32, i32) {
    %c4_i32 = arith.constant 4 : i32
    %0 = arith.muli %arg0, %c4_i32 : i32
    %1 = arith.addi %0, %arg1 : i32
    %c0_i32 = arith.constant 0 : i32
    %c0_i32_0 = arith.constant 0 : i32
    %c0_i32_1 = arith.constant 0 : i32
    return %1, %c0_i32, %c0_i32_0 : i32, i32, i32
  }
  func.func @transform_1(%arg0: i32, %arg1: i32) -> (i32, i32, i32) {
    %c4_i32 = arith.constant 4 : i32
    %0 = arith.muli %arg0, %c4_i32 : i32
    %1 = arith.addi %0, %arg1 : i32
    %c4_i32_0 = arith.constant 4 : i32
    %c0_i32 = arith.constant 0 : i32
    %2 = arith.cmpi eq, %c4_i32_0, %c0_i32 : i32
    %c1_i32 = arith.constant 1 : i32
    %3 = arith.select %2, %c1_i32, %c4_i32_0 : i32
    %4 = arith.remsi %1, %3 : i32
    %c0_i32_1 = arith.constant 0 : i32
    %5 = arith.cmpi ne, %4, %c0_i32_1 : i32
    %c0_i32_2 = arith.constant 0 : i32
    %6 = arith.cmpi slt, %4, %c0_i32_2 : i32
    %c0_i32_3 = arith.constant 0 : i32
    %7 = arith.cmpi slt, %3, %c0_i32_3 : i32
    %8 = arith.xori %6, %7 : i1
    %9 = arith.andi %8, %5 : i1
    %10 = arith.addi %4, %3 : i32
    %11 = arith.select %9, %10, %4 : i32
    %c0_i32_4 = arith.constant 0 : i32
    %c0_i32_5 = arith.constant 0 : i32
    %c0_i32_6 = arith.constant 0 : i32
    return %11, %c0_i32_4, %c0_i32_5 : i32, i32, i32
  }
  func.func @transform_2(%arg0: i32, %arg1: i32) -> (i32, i32) {
    %c0_i32 = arith.constant 0 : i32
    %c0_i32_0 = arith.constant 0 : i32
    %c0_i32_1 = arith.constant 0 : i32
    return %c0_i32, %c0_i32_0 : i32, i32
  }
  func.func @transform_3(%arg0: i32, %arg1: i32) -> (i32, i32) {
    %c0_i32 = arith.constant 0 : i32
    %c0_i32_0 = arith.constant 0 : i32
    %c0_i32_1 = arith.constant 0 : i32
    return %c0_i32, %c0_i32_0 : i32, i32
  }
  func.func @transform_4(%arg0: i32, %arg1: i32) -> (i32, i32) {
    %c0_i32 = arith.constant 0 : i32
    %c0_i32_0 = arith.constant 0 : i32
    %c0_i32_1 = arith.constant 0 : i32
    return %c0_i32, %c0_i32_0 : i32, i32
  }
  func.func @transform_5(%arg0: i32, %arg1: i32) -> (i32, i32) {
    %c0_i32 = arith.constant 0 : i32
    %c0_i32_0 = arith.constant 0 : i32
    %c0_i32_1 = arith.constant 0 : i32
    return %c0_i32, %c0_i32_0 : i32, i32
  }
  func.func @transform_6(%arg0: i32, %arg1: i32) -> (i32, i32) {
    %c0_i32 = arith.constant 0 : i32
    %c0_i32_0 = arith.constant 0 : i32
    %c0_i32_1 = arith.constant 0 : i32
    return %c0_i32, %c0_i32_0 : i32, i32
  }
  func.func @transform_7(%arg0: i32, %arg1: i32) -> (i32, i32) {
    %c0_i32 = arith.constant 0 : i32
    %c0_i32_0 = arith.constant 0 : i32
    %c0_i32_1 = arith.constant 0 : i32
    return %c0_i32, %c0_i32_0 : i32, i32
  }
  func.func @transform_8(%arg0: i32, %arg1: i32) -> (i32, i32, i32) {
    %c4_i32 = arith.constant 4 : i32
    %0 = arith.muli %arg0, %c4_i32 : i32
    %1 = arith.addi %0, %arg1 : i32
    %c0_i32 = arith.constant 0 : i32
    %c0_i32_0 = arith.constant 0 : i32
    %c0_i32_1 = arith.constant 0 : i32
    return %1, %c0_i32, %c0_i32_0 : i32, i32, i32
  }
  func.func @transform_9(%arg0: i32, %arg1: i32) -> (i32, i32, i32) {
    %c0_i32 = arith.constant 0 : i32
    %c0_i32_0 = arith.constant 0 : i32
    %c0_i32_1 = arith.constant 0 : i32
    return %arg0, %c0_i32, %c0_i32_0 : i32, i32, i32
  }
}

</mosaic_0001>

<bundles_post_ra>
// kernel: forward.1
= control target key start
LH: loop header
LB: loop body
LE: loop exit
PB: predicated region body
PF: predicated region fallthrough
CT: control target
= control target key end

     0   :  { %s1731_s30 = smov 0   ;;  %s1733_s10 = smov 0   ;;  %s2471_s0 = inlined_call_operand.vmem [shape: f32[8,98,4], index: 0, kind: input, shape index: {}]   ;;  %s2472_s1 = inlined_call_operand.vmem [shape: f32[4,8,64], index: 1, kind: input, shape index: {}]   ;;  %s2473_s2 = inlined_call_operand.vmem [shape: bf16[36,24], index: 2, kind: input, shape index: {}]   ;;  %s2474_s3 = inlined_call_operand.vmem [shape: f32[1,24], index: 3, kind: input, shape index: {}]   ;;  %s2475_s4 = inlined_call_operand.vmem [shape: bf16[24,36], index: 4, kind: input, shape index: {}]   ;;  %s2476_s5 = inlined_call_operand.vmem [shape: f32[1,36], index: 5, kind: input, shape index: {}]   ;;  %s2477_s6 = inlined_call_operand.vmem [shape: bf16[24,8], index: 6, kind: input, shape index: {}]   ;;  %s2478_s7 = inlined_call_operand.vmem [shape: f32[1,8], index: 7, kind: input, shape index: {}]   ;;  %s2479_s8 = inlined_call_operand.vmem [shape: f32[8,64,8], index: 8, kind: output, shape index: {0}]   ;;  %s2480_s9 = inlined_call_operand.vmem [shape: f32[2,8,36], index: 9, kind: output, shape index: {1}]  }
   0x1   :  { %s1735_s11 = smov 0   ;;  %s1737_s12 = smov 0  }
   0x2   :  { %s1739_s13 = smov 0  }
   0x3 LB: > { %s29_s14 = sadd.s32 1, %s1662_s11  ;;  %s32_s15 = sadd.s32 1, %s1666_s12  ;;  %s1670_s13 = sphi %s1739_s13, %s20_s13   ;;  %s1666_s12 = sphi %s1737_s12, %s2498_s12   ;;  %s1662_s11 = sphi %s1735_s11, %s2497_s11   ;;  %s1658_s10 = sphi %s1733_s10, %s2496_s10   ;;  %s1654_s30 = sphi %s1731_s30, %s2495_s30  }
   0x4   : > { %p30_p0 = scmp.ge.s32.totalorder %s29_s14, 4  ;;  %p1526_p1 = scmp.ge.s32.totalorder %s1670_s13, 1 }
   0x5   : > { %p379_p2 = scmp.lt.s32.totalorder %s1670_s13, 9 }
   0x6   : > { %s2500_s14 = smov (%p30_p0, %s29_s14), 0  ;;  %s2502_s15 = smov (!%p30_p0, %s32_s15), %s1666_s12 }
   0x7   : > { %p380_p3 = pnand %p1526_p1, %p379_p2  ;;  %p34_p4 = scmp.ge.s32.totalorder %s2502_s15, 2 }
   0x8   : > { %s1527_s16 = sshll.u32 (!%p380_p3), %s1658_s10, 2  ;;  %s1672_s23 = smov (!%p380_p3), 12  }
   0x9   : > { %s2504_s15 = smov (%p34_p4, %s2502_s15), 0  ;;  %383 = sbr.rel (%p380_p3) target bundleno = 1013 (0x3f5), region = 52 }
   0xa   : > { %s1767_s17 = sadd.s32 (!%p380_p3), %s1654_s30, %s1527_s16  ;;  %s1673_s24 = smov (!%p380_p3), 8  }
   0xb   : > { %p443_p5 = scmp.lt.s32.totalorder (!%p380_p3), %s1767_s17, 7  ;;  %s1674_s25 = smov (!%p380_p3), 4  }
   0xc   : > { %s1675_s26 = smov (!%p380_p3), 20   ;;  %s1676_s27 = smov (!%p380_p3), 16  }
   0xd   : > { %p491_p6 = scmp.lt.s32.totalorder (!%p380_p3), %s1658_s10, 1  ;;  %s2481_s28 = smov (!%p380_p3), 24  }
   0xe   : > { %s1771_s18 = scalar_select %p443_p5, %s1767_s17, 7  ;;  %vm560_vm0 = vcmask 1045504   ;;  %vm518_vm1 = vcmask 1046528   ;;  %v846_v50 = vld [vmem:[%s2473_s2 + $0x10] sm:$0x3]  ;;  %vm879_vm2 = vcmask 1041408  }
   0xf   : > { %s2506_s10 = smov (!%p491_p6, %s1658_s10), 1  ;;  %s1679_s21 = smov 28   ;;  %v860_v52 = vunpack.c.l.b16 %v846_v50  ;;  %v1576_v61 = vld [vmem:[%s2473_s2 + $0x8] sm:$0xff]  ;;  %vm766_vm3 = vcmask 31744   ;;  %vm775_vm4 = vcmask 64512   ;;  %vm784_vm5 = vcmask 97280  }
  0x10   : > { %s1579_s19 = smul.u32 104, %s1771_s18  ;;  %s1537_s29 = sshll.u32 %s2506_s10, 3  ;;  %vm793_vm6 = vcmask 130048   ;;  %vm802_vm7 = vcmask 162816   ;;  %vm811_vm8 = vcmask 195584   ;;  %vm820_vm9 = vcmask 228352  }
  0x11   : > { %s1840_s20 = scalar_lea.vmem %s2480_s9, %s1537_s29  ;;  %s1678_s10 = smov 32   ;;  %v863_v55 = vpack.c.b16 %v860_v52, %v860_v52  ;;  %vm829_vm10 = vcmask 261120   ;;  %vm2483_vm11 = vcmask 293888  }
  0x12   : > { %s1777_s22 = scalar_lea.vmem %s2471_s0, %s1579_s19  ;;  %s1574_s16 = sshll.u32 %s1771_s18, 6 }
  0x13   : > { %v1780_v0 = vld [vmem:[%s1777_s22] sm:$0xff]  ;;  %v1783_v1 = vld [vmem:[%s1777_s22 + $0x8] sm:$0xff]  ;;  %v1786_v2 = vld [vmem:[%s1777_s22 + $0x10] sm:$0xff]  ;;  %v881_v60 = vsel %vm879_vm2, %v863_v55, 0  ;;  %s453_s18 = ssub.s32 0, %s1767_s17  ;;  %p452_p7 = scmp.lt.s32.totalorder %s1767_s17, 0 }
  0x14   : > { %v561_v3 = vrot.slane %v1780_v0, 2  ;;  %v562_v4 = vrot.slane %v1783_v1, 2  ;;  %v519_v5 = vrot.slane %v1780_v0, 1  ;;  %v520_v6 = vrot.slane %v1783_v1, 1  ;;  %603 = vrot.lane.b32.xlu2 %v1786_v2, %s1672_s23  ;;  %v1801_v11 = vld [vmem:[%s1777_s22 + $0x18] sm:$0xff]  ;;  %v1808_v14 = vld [vmem:[%s1777_s22 + $0x20] sm:$0xff]  ;;  %888 = vmatpush.bf16.msra.mxu0 %v881_v60 }
  0x15   : > { %v564_v9 = vrot.slane %v1786_v2, 2  ;;  %v522_v10 = vrot.slane %v1786_v2, 1  ;;  %v566_v15 = vrot.slane %v1801_v11, 2  ;;  %v524_v16 = vrot.slane %v1801_v11, 1  ;;  %v1824_v22 = vld [vmem:[%s1777_s22 + $0x28] sm:$0xff]  ;;  %v1831_v24 = vld [vmem:[%s1777_s22 + $0x30] sm:$0xff] }
  0x16   : > { %v563_v7 = vsel %vm560_vm0, %v561_v3, %v562_v4  ;;  %v521_v8 = vsel %vm518_vm1, %v519_v5, %v520_v6  ;;  %v526_v17 = vrot.slane %v1808_v14, 1  ;;  %v568_v21 = vrot.slane %v1808_v14, 2  ;;  %v1864_v33 = vld [vmem:[%s1777_s22 + $0x38] sm:$0xff]  ;;  %v1867_v34 = vld [vmem:[%s1777_s22 + $0x40] sm:$0xff]  ;;  %v505_v45 = vld [vmem:[%s1777_s22 + $0x48] sm:$0xff]  ;;  %p1571_p10 = scmp.ne.s32.totalorder %s1654_s30, 0 }
  0x17   : > { %578 = vrot.lane.b32.xlu1 %v563_v7, %s1673_s24  ;;  %536 = vrot.lane.b32.xlu0 %v521_v8, %s1674_s25  ;;  %v565_v12 = vsel %vm560_vm0, %v562_v4, %v564_v9  ;;  %v523_v13 = vsel %vm518_vm1, %v520_v6, %v522_v10  ;;  %v567_v18 = vsel %vm560_vm0, %v564_v9, %v566_v15  ;;  %v570_v25 = vrot.slane %v1824_v22, 2  ;;  %v1908_v49 = vld [vmem:[%s1777_s22 + $0x50] sm:$0xff]  ;;  %v1575_v4 = vld [vmem:[%s2473_s2] sm:$0xff] }
  0x18   : > { %v527_v19 = vsel %vm518_vm1, %v524_v16, %v526_v17  ;;  %v525_v20 = vsel %vm518_vm1, %v522_v10, %v524_v16  ;;  %v569_v23 = vsel %vm560_vm0, %v566_v15, %v568_v21  ;;  %v528_v26 = vrot.slane %v1824_v22, 1  ;;  %889 = vmatpush.bf16.msra.mxu0 %v1576_v61 }
  0x19   : > { %v530_v27 = vrot.slane %v1831_v24, 1  ;;  %v571_v28 = vsel %vm560_vm0, %v568_v21, %v570_v25  ;;  %v572_v31 = vrot.slane %v1831_v24, 2  ;;  %v534_v35 = vrot.slane %v1867_v34, 1 }
  0x1a   : > { %v529_v30 = vsel %vm518_vm1, %v526_v17, %v528_v26  ;;  %v532_v36 = vrot.slane %v1864_v33, 1  ;;  %v574_v39 = vrot.slane %v1864_v33, 2  ;;  %v576_v40 = vrot.slane %v1867_v34, 2 }
  0x1b   : > { %v531_v29 = vsel %vm518_vm1, %v528_v26, %v530_v27  ;;  %v573_v32 = vsel %vm560_vm0, %v570_v25, %v572_v31  ;;  %v628_v47 = vrot.slane %v505_v45, 1  ;;  %v658_v51 = vrot.slane %v1908_v49, 2 }
  0x1c   : > { %605 = vrot.lane.b32.xlu2 %v1801_v11, %s1672_s23  ;;  %v535_v37 = vsel %vm518_vm1, %v532_v36, %v534_v35  ;;  %v533_v38 = vsel %vm518_vm1, %v530_v27, %v532_v36  ;;  %v577_v41 = vsel %vm560_vm0, %v574_v39, %v576_v40  ;;  %v575_v42 = vsel %vm560_vm0, %v572_v31, %v574_v39 }
  0x1d   : > { %v629_v48 = vsel %vm518_vm1, %v534_v35, %v628_v47  ;;  %v656_v54 = vrot.slane %v505_v45, 2  ;;  %v630_v56 = vrot.slane %v1908_v49, 1  ;;  %890 = vmatpush.bf16.msra.mxu0 %v1575_v4 }
  0x1f   : > { %580 = vrot.lane.b32.xlu1 %v565_v12, %s1673_s24  ;;  %538 = vrot.lane.b32.xlu0 %v523_v13, %s1674_s25  ;;  %v659_v59 = vsel %vm560_vm0, %v656_v54, %v658_v51  ;;  %v657_v62 = vsel %vm560_vm0, %v576_v40, %v656_v54  ;;  %v631_v63 = vsel %vm518_vm1, %v628_v47, %v630_v56 }
  0x24   : > { %660 = vrot.lane.b32.xlu2 %v567_v18, %s1675_s26 }
  0x27   : > { %634 = vrot.lane.b32.xlu1 %v527_v19, %s1676_s27  ;;  %632 = vrot.lane.b32.xlu0 %v525_v20, %s1676_s27 }
  0x2c   : > { %687 = vrot.lane.b32.xlu2 %v1824_v22, %s2481_s28 }
  0x2f   : > { %685 = vrot.lane.b32.xlu1 %v1808_v14, %s2481_s28  ;;  %662 = vrot.lane.b32.xlu0 %v569_v23, %s1675_s26 }
  0x34   : > { %742 = vrot.lane.b32.xlu2 %v571_v28, %s1678_s10 }
  0x37   : > { %716 = vrot.lane.b32.xlu1 %v531_v29, %s1679_s21  ;;  %714 = vrot.lane.b32.xlu0 %v529_v30, %s1679_s21 }
  0x3c   : > { %542 = vrot.lane.b32.xlu2 %v527_v19, %s1674_s25 }
  0x3f   : > { %540 = vrot.lane.b32.xlu1 %v525_v20, %s1674_s25  ;;  %744 = vrot.lane.b32.xlu0 %v573_v32, %s1678_s10 }
  0x44   : > { %607 = vrot.lane.b32.xlu2 %v1808_v14, %s1672_s23 }
  0x47   : > { %584 = vrot.lane.b32.xlu1 %v569_v23, %s1673_s24  ;;  %582 = vrot.lane.b32.xlu0 %v567_v18, %s1673_s24  ;;  %v507_v23 = vld [vmem:[%s1777_s22 + $0x58] sm:$0xff] }
  0x48   : > { %v710_v35 = vrot.slane %v507_v23, 1 }
  0x4c   : > { %638 = vrot.lane.b32.xlu2 %v531_v29, %s1676_s27 }
  0x4f   : > { %636 = vrot.lane.b32.xlu1 %v529_v30, %s1676_s27  ;;  %609 = vrot.lane.b32.xlu0 %v1824_v22, %s1672_s23 }
  0x54   : > { %689 = vrot.lane.b32.xlu2 %v1831_v24, %s2481_s28 }
  0x57   : > { %666 = vrot.lane.b32.xlu1 %v573_v32, %s1675_s26  ;;  %664 = vrot.lane.b32.xlu0 %v571_v28, %s1675_s26 }
  0x5c   : > { %720 = vrot.lane.b32.xlu2 %v535_v37, %s1679_s21 }
  0x5f   : > { %718 = vrot.lane.b32.xlu1 %v533_v38, %s1679_s21  ;;  %691 = vrot.lane.b32.xlu0 %v1864_v33, %s2481_s28 }
  0x64   : > { %544 = vrot.lane.b32.xlu2 %v529_v30, %s1674_s25 }
  0x67   : > { %748 = vrot.lane.b32.xlu1 %v577_v41, %s1678_s10  ;;  %746 = vrot.lane.b32.xlu0 %v575_v42, %s1678_s10 }
  0x6c   : > { %588 = vrot.lane.b32.xlu2 %v573_v32, %s1673_s24  ;;  %v738_v32 = vrot.slane %v507_v23, 2 }
  0x6e   : > { %v1889_v43 = vpop.permute.xlu2 %603  ;;  %v739_v40 = vsel %vm560_vm0, %v658_v51, %v738_v32 }
  0x6f   : > { %586 = vrot.lane.b32.xlu1 %v571_v28, %s1673_s24  ;;  %546 = vrot.lane.b32.xlu0 %v531_v29, %s1674_s25  ;;  %v508_v29 = vld [vmem:[%s1777_s22 + $0x60] sm:$0x3] }
  0x70   : > { %v712_v36 = vrot.slane %v508_v29, 1  ;;  %v740_v47 = vrot.slane %v508_v29, 2 }
  0x72   : > { %v741_v51 = vsel %vm560_vm0, %v738_v32, %v740_v47 }
  0x74   : > { %640 = vrot.lane.b32.xlu2 %v533_v38, %s1676_s27 }
  0x76   : > { %v1894_v44 = vpop.permute.xlu2 %605 }
  0x77   : > { %613 = vrot.lane.b32.xlu1 %v1864_v33, %s1672_s23  ;;  %611 = vrot.lane.b32.xlu0 %v1831_v24, %s1672_s23 }
  0x7c   : > { %670 = vrot.lane.b32.xlu2 %v577_v41, %s1675_s26 }
  0x7e   : > { %v1902_v46 = vpop.permute.xlu2 %660 }
  0x7f   : > { %668 = vrot.lane.b32.xlu1 %v575_v42, %s1675_s26  ;;  %642 = vrot.lane.b32.xlu0 %v535_v37, %s1676_s27 }
  0x84   : > { %722 = vrot.lane.b32.xlu2 %v629_v48, %s1679_s21 }
  0x86   : > { %v1915_v53 = vpop.permute.xlu2 %687 }
  0x87   : > { %695 = vrot.lane.b32.xlu1 %v505_v45, %s2481_s28  ;;  %693 = vrot.lane.b32.xlu0 %v1867_v34, %s2481_s28 }
  0x89   : > { %v579_v57 = vpop.permute.xlu1 %578  ;;  %v537_v58 = vpop.permute.xlu0 %536 }
  0x8a   : > { %v767_v15 = vsel %vm766_vm3, %v1780_v0, %v537_v58 }
  0x8b   : > { %v776_v17 = vsel %vm775_vm4, %v767_v15, %v579_v57 }
  0x8c   : > { %752 = vrot.lane.b32.xlu2 %v659_v59, %s1678_s10  ;;  %v785_v0 = vsel %vm784_vm5, %v776_v17, %v1889_v43 }
  0x8e   : > { %v743_v3 = vpop.permute.xlu2 %742 }
  0x8f   : > { %750 = vrot.lane.b32.xlu1 %v657_v62, %s1678_s10  ;;  %724 = vrot.lane.b32.xlu0 %v631_v63, %s1679_s21 }
  0x91   : > { %v581_v5 = vpop.permute.xlu1 %580  ;;  %v539_v6 = vpop.permute.xlu0 %538 }
  0x92   : > { %v768_v16 = vsel %vm766_vm3, %v1783_v1, %v539_v6 }
  0x93   : > { %v777_v18 = vsel %vm775_vm4, %v768_v16, %v581_v5 }
  0x94   : > { %590 = vrot.lane.b32.xlu2 %v575_v42, %s1673_s24  ;;  %v786_v1 = vsel %vm784_vm5, %v777_v18, %v1894_v44  ;;  %v713_v44 = vsel %vm518_vm1, %v710_v35, %v712_v36 }
  0x96   : > { %v1941_v7 = vpop.permute.xlu2 %542 }
  0x97   : > { %550 = vrot.lane.b32.xlu1 %v535_v37, %s1674_s25  ;;  %548 = vrot.lane.b32.xlu0 %v533_v38, %s1674_s25  ;;  %v770_v58 = vsel %vm766_vm3, %v1801_v11, %v1941_v7 }
  0x99   : > { %v635_v8 = vpop.permute.xlu1 %634  ;;  %v633_v9 = vpop.permute.xlu0 %632 }
  0x9a   : > { %v794_v21 = vsel %vm793_vm6, %v785_v0, %v633_v9  ;;  %v795_v25 = vsel %vm793_vm6, %v786_v1, %v635_v8 }
  0x9b   : > { %v803_v27 = vsel %vm802_vm7, %v794_v21, %v1902_v46 }
  0x9c   : > { %617 = vrot.lane.b32.xlu2 %v505_v45, %s1672_s23  ;;  %v711_v45 = vsel %vm518_vm1, %v630_v56, %v710_v35 }
  0x9e   : > { %v1947_v13 = vpop.permute.xlu2 %607 }
  0x9f   : > { %615 = vrot.lane.b32.xlu1 %v1867_v34, %s1672_s23  ;;  %592 = vrot.lane.b32.xlu0 %v577_v41, %s1673_s24  ;;  %s2484_s23 = smov 24  }
  0xa1   : > { %v686_v10 = vpop.permute.xlu1 %685  ;;  %v663_v12 = vpop.permute.xlu0 %662 }
  0xa2   : > { %v804_v28 = vsel %vm802_vm7, %v795_v25, %v663_v12  ;;  %v812_v30 = vsel %vm811_vm8, %v803_v27, %v686_v10 }
  0xa3   : > { %v813_v34 = vsel %vm811_vm8, %v804_v28, %v1915_v53 }
  0xa4   : > { %672 = vrot.lane.b32.xlu2 %v657_v62, %s1675_s26 }
  0xa6   : > { %v639_v26 = vpop.permute.xlu2 %638 }
  0xa7   : > { %646 = vrot.lane.b32.xlu1 %v631_v63, %s1676_s27  ;;  %644 = vrot.lane.b32.xlu0 %v629_v48, %s1676_s27  ;;  %s1530_s27 = smin.u32 %s453_s18, %s1767_s17 }
  0xa8   : > { %s455_s28 = sand.u32 3, %s1530_s27  }
  0xa9   : > { %v717_v19 = vpop.permute.xlu1 %716  ;;  %v715_v20 = vpop.permute.xlu0 %714 }
  0xaa   : > { %v821_v31 = vsel %vm820_vm9, %v812_v30, %v715_v20  ;;  %v822_v37 = vsel %vm820_vm9, %v813_v34, %v717_v19 }
  0xab   : > { %v1982_v41 = vsel %vm829_vm10, %v821_v31, %v743_v3 }
  0xac   : > { %699 = vrot.lane.b32.xlu2 %v507_v23, %s2484_s23 }
  0xae   : > { %v690_v46 = vpop.permute.xlu2 %689 }
  0xaf   : > { %697 = vrot.lane.b32.xlu1 %v1908_v49, %s2484_s23  ;;  %674 = vrot.lane.b32.xlu0 %v659_v59, %s1675_s26  ;;  %s2401_s26 = scalar_lea.vmem %s2479_s8, %s1574_s16 }
  0xb1   : > { %v541_v38 = vpop.permute.xlu1 %540  ;;  %v745_v39 = vpop.permute.xlu0 %744 }
  0xb2   : > { %v1985_v42 = vsel %vm829_vm10, %v822_v37, %v745_v39  ;;  %v769_v57 = vsel %vm766_vm3, %v1786_v2, %v541_v38 }
  0xb3   : > { %v838_v43 = vpack.c.bf16 %v1985_v42, %v1982_v41 }
  0xb4   : > { %754 = vrot.lane.b32.xlu2 %v739_v40, %s1678_s10 }
  0xb5   : > { %1546 = vmatmul.msk.bf16.vlgmr.msra.gmra.mxu0 %vm2483_vm11, %v838_v43 }
  0xb6   : > { %v721_v52 = vpop.permute.xlu2 %720 }
  0xb7   : > { %728 = vrot.lane.b32.xlu1 %v713_v44, %s1679_s21  ;;  %726 = vrot.lane.b32.xlu0 %v711_v45, %s1679_s21 }
  0xb9   : > { %v585_v48 = vpop.permute.xlu1 %584  ;;  %v583_v50 = vpop.permute.xlu0 %582 }
  0xba   : > { %v779_v59 = vsel %vm775_vm4, %v770_v58, %v585_v48  ;;  %v778_v60 = vsel %vm775_vm4, %v769_v57, %v583_v50 }
  0xbb   : > { %v787_v3 = vsel %vm784_vm5, %v778_v60, %v1947_v13 }
  0xbe   : > { %v545_v56 = vpop.permute.xlu2 %544 }
  0xbf   : > { %756 = vrot.lane.b32.xlu0 %v741_v51, %s1678_s10  ;;  %v771_v27 = vsel %vm766_vm3, %v1808_v14, %v545_v56  ;;  %s456_s10 = ssub.s32 0, %s455_s28 }
  0xc0   : > { %s2508_s10 = smov (!%p452_p7, %s456_s10), %s455_s28 }
  0xc1   : > { %v637_v49 = vpop.permute.xlu1 %636  ;;  %v610_v53 = vpop.permute.xlu0 %609  ;;  %p1532_p8 = scmp.lt.s32.totalorder %s2508_s10, 0  ;;  %s462_s21 = sadd.s32 4, %s2508_s10 }
  0xc2   : > { %v788_v61 = vsel %vm784_vm5, %v779_v59, %v610_v53  ;;  %v796_v4 = vsel %vm793_vm6, %v787_v3, %v637_v49  ;;  %v912_v3 = vlaneseq }
  0xc3   : > { %v797_v5 = vsel %vm793_vm6, %v788_v61, %v639_v26  ;;  %s2510_s21 = smov (!%p1532_p8, %s462_s21), %s2508_s10 }
  0xc4   : > { %p464_p9 = scmp.lt.s32.totalorder %s2510_s21, 3 }
  0xc6   : > { %v589_v2 = vpop.permute.xlu2 %588  ;;  %s2512_s21 = smov (!%p464_p9, %s2510_s21), 3 }
  0xc7   : > { %s1533_s19 = sshll.u32 %s2512_s21, 3 }
  0xc8   : > { %s467_s16 = scalar_lea.vmem %s2472_s1, %s1533_s19 }
  0xc9   : > { %v667_v54 = vpop.permute.xlu1 %666  ;;  %v665_v55 = vpop.permute.xlu0 %664 }
  0xca   : > { %v806_v6 = vsel %vm802_vm7, %v797_v5, %v667_v54  ;;  %v805_v11 = vsel %vm802_vm7, %v796_v4, %v665_v55 }
  0xcb   : > { %v814_v8 = vsel %vm811_vm8, %v805_v11, %v690_v46 }
  0xce   : > { %v641_v18 = vpop.permute.xlu2 %640 }
  0xd1   : > { %v719_v62 = vpop.permute.xlu1 %718  ;;  %v692_v63 = vpop.permute.xlu0 %691 }
  0xd2   : > { %v815_v7 = vsel %vm811_vm8, %v806_v6, %v692_v63  ;;  %v823_v9 = vsel %vm820_vm9, %v814_v8, %v719_v62  ;;  %v2060_v8 = vand.u32 127, %v912_v3 }
  0xd3   : > { %v824_v10 = vsel %vm820_vm9, %v815_v7, %v721_v52 }
  0xd4   : > { %vm1007_vm12 = vcmp.ge.s32.totalorder %v2060_v8, 8  ;;  %vm1008_vm13 = vcmp.lt.s32.totalorder %v2060_v8, 24  ;;  %vm915_vm15 = vcmp.lt.s32.totalorder %v2060_v8, 8  ;;  %v1631_v8 = vld [vmem:[%s2478_s7] ss:$0 sm:$0xff] }
  0xd5   : > { %vm2082_vm14 = vmand %vm1007_vm12, %vm1008_vm13 }
  0xd6   : > { %v671_v20 = vpop.permute.xlu2 %670 }
  0xd9   : > { %v749_v12 = vpop.permute.xlu1 %748  ;;  %v747_v15 = vpop.permute.xlu0 %746 }
  0xda   : > { %v2018_v13 = vsel %vm829_vm10, %v824_v10, %v749_v12  ;;  %v2021_v16 = vsel %vm829_vm10, %v823_v9, %v747_v15 }
  0xdb   : > { %v839_v17 = vpack.c.bf16 %v2018_v13, %v2021_v16 }
  0xdd   : > { %1547 = vmatmul.msk.bf16.gmra.mxu0 %vm2483_vm11, %v839_v17 }
  0xde   : > { %v723_v26 = vpop.permute.xlu2 %722 }
  0xe1   : > { %v587_v0 = vpop.permute.xlu1 %586  ;;  %v547_v19 = vpop.permute.xlu0 %546 }
  0xe2   : > { %v780_v28 = vsel %vm775_vm4, %v771_v27, %v587_v0  ;;  %v772_v29 = vsel %vm766_vm3, %v1824_v22, %v547_v19 }
  0xe3   : > { %v781_v34 = vsel %vm775_vm4, %v772_v29, %v589_v2 }
  0xe6   : > { %v753_v37 = vpop.permute.xlu2 %752 }
  0xe9   : > { %v614_v21 = vpop.permute.xlu1 %613  ;;  %v612_v1 = vpop.permute.xlu0 %611 }
  0xea   : > { %v789_v30 = vsel %vm784_vm5, %v780_v28, %v612_v1  ;;  %v790_v35 = vsel %vm784_vm5, %v781_v34, %v614_v21 }
  0xeb   : > { %v798_v36 = vsel %vm793_vm6, %v789_v30, %v641_v18  ;;  %v2070_v18 = vld [vmem:[%s2474_s3] ss:$0 sm:$0xff] }
  0xee   : > { %v591_v51 = vpop.permute.xlu2 %590 }
  0xf1   : > { %v669_v23 = vpop.permute.xlu1 %668  ;;  %v643_v25 = vpop.permute.xlu0 %642 }
  0xf2   : > { %v807_v38 = vsel %vm802_vm7, %v798_v36, %v669_v23  ;;  %v799_v14 = vsel %vm793_vm6, %v790_v35, %v643_v25 }
  0xf3   : > { %v808_v40 = vsel %vm802_vm7, %v799_v14, %v671_v20 }
  0xf6   : > { %v618_v53 = vpop.permute.xlu2 %617 }
  0xf9   : > { %v696_v31 = vpop.permute.xlu1 %695  ;;  %v694_v32 = vpop.permute.xlu0 %693 }
  0xfa   : > { %v816_v39 = vsel %vm811_vm8, %v807_v38, %v694_v32  ;;  %v817_v22 = vsel %vm811_vm8, %v808_v40, %v696_v31 }
  0xfb   : > { %v825_v43 = vsel %vm820_vm9, %v816_v39, %v723_v26 }
  0xfe   : > { %v673_v58 = vpop.permute.xlu2 %672 }
 0x101   : > { %v751_v44 = vpop.permute.xlu1 %750  ;;  %v725_v45 = vpop.permute.xlu0 %724 }
 0x102   : > { %v2042_v46 = vsel %vm829_vm10, %v825_v43, %v751_v44  ;;  %v826_v47 = vsel %vm820_vm9, %v817_v22, %v725_v45  ;;  %v1265_v43 = vmul.f32 %v2018_v13, %v2018_v13  ;;  %v1264_v44 = vmul.f32 %v2021_v16, %v2021_v16 }
 0x103   : > { %v2046_v48 = vsel %vm829_vm10, %v826_v47, %v753_v37  ;;  %v1266_v22 = vmul.f32 %v2042_v46, %v2042_v46  ;;  %v1263_v45 = vmul.f32 %v1985_v42, %v1985_v42  ;;  %v1262_v47 = vmul.f32 %v1982_v41, %v1982_v41 }
 0x104   : > { %v840_v50 = vpack.c.bf16 %v2046_v48, %v2042_v46  ;;  %v1267_v39 = vmul.f32 %v2046_v48, %v2046_v48 }
 0x106   : > { %1548 = vmatmul.msk.bf16.gmra.mxu0 %vm2483_vm11, %v840_v50  ;;  %v700_v63 = vpop.permute.xlu2 %699 }
 0x109   : > { %v551_v52 = vpop.permute.xlu1 %550  ;;  %v549_v49 = vpop.permute.xlu0 %548 }
 0x10a   : > { %v774_v61 = vsel %vm766_vm3, %v1864_v33, %v551_v52  ;;  %v773_v62 = vsel %vm766_vm3, %v1831_v24, %v549_v49 }
 0x10b   : > { %v782_v4 = vsel %vm775_vm4, %v773_v62, %v591_v51 }
 0x10e   : > { %v755_v17 = vpop.permute.xlu2 %754 }
 0x111   : > { %v616_v54 = vpop.permute.xlu1 %615  ;;  %v593_v55 = vpop.permute.xlu0 %592 }
 0x112   : > { %v783_v5 = vsel %vm775_vm4, %v774_v61, %v593_v55  ;;  %v791_v2 = vsel %vm784_vm5, %v782_v4, %v616_v54 }
 0x113   : > { %v792_v7 = vsel %vm784_vm5, %v783_v5, %v618_v53 }
 0x119   : > { %v645_v56 = vpop.permute.xlu0 %644  ;;  %v647_v57 = vpop.permute.xlu1 %646 }
 0x11a   : > { %v800_v11 = vsel %vm793_vm6, %v791_v2, %v645_v56  ;;  %v801_v33 = vsel %vm793_vm6, %v792_v7, %v647_v57 }
 0x11b   : > { %v809_v9 = vsel %vm802_vm7, %v800_v11, %v673_v58 }
 0x121   : > { %v675_v59 = vpop.permute.xlu0 %674  ;;  %v698_v60 = vpop.permute.xlu1 %697 }
 0x122   : > { %v810_v24 = vsel %vm802_vm7, %v801_v33, %v675_v59  ;;  %v818_v10 = vsel %vm811_vm8, %v809_v9, %v698_v60 }
 0x123   : > { %v819_v0 = vsel %vm811_vm8, %v810_v24, %v700_v63 }
 0x129   : > { %v727_v6 = vpop.permute.xlu0 %726  ;;  %v729_v12 = vpop.permute.xlu1 %728 }
 0x12a   : > { %v827_v15 = vsel %vm820_vm9, %v818_v10, %v727_v6  ;;  %v828_v19 = vsel %vm820_vm9, %v819_v0, %v729_v12 }
 0x12b   : > { %v2077_v21 = vsel %vm829_vm10, %v827_v15, %v755_v17 }
 0x12c   : > { %v1268_v38 = vmul.f32 %v2077_v21, %v2077_v21 }
 0x131   : > { %v757_v20 = vpop.permute.xlu0 %756 }
 0x132   : > { %v2080_v1 = vsel %vm829_vm10, %v828_v19, %v757_v20  ;;  %v892_v23 = vpop.f32.mrf.mxu0 }
 0x133   : > { %v2088_v26 = vadd.f32 %v2070_v18, %v892_v23  ;;  %1250 = vmatpush.msra.mxu3 %v2080_v1  ;;  %v841_v27 = vpack.c.bf16 %v2080_v1, %v2077_v21  ;;  %v1269_v37 = vmul.f32 %v2080_v1, %v2080_v1 }
 0x135   : > { %1549 = vmatmul.msk.bf16.gmra.mxu0 %vm2483_vm11, %v841_v27  ;;  %1251 = vmatpush.msra.mxu3 %v2077_v21  ;;  %v2098_v28 = vsel %vm2082_vm14, %v2088_v26, -inf  ;;  %v2103_v29 = vsel %vm915_vm15, %v2088_v26, -inf }
 0x136   : > { %v1020_v30 = vsel %vm811_vm8, %v2098_v28, -inf  ;;  %v927_v31 = vsel %vm811_vm8, %v2103_v29, -inf }
 0x137   : > { %1021 = vmax.xlane.f32.xlu0 %v1020_v30  ;;  %928 = vmax.xlane.f32.xlu1 %v927_v31 }
 0x138   : > { %1252 = vmatpush.msra.mxu3 %v2046_v48 }
 0x13a   : > { %1253 = vmatpush.msra.mxu3 %v2042_v46  ;;  %v894_v32 = vpop.f32.mrf.mxu0 }
 0x13b   : > { %v2112_v34 = vadd.f32 %v2070_v18, %v894_v32 }
 0x13c   : > { %1254 = vmatpush.msra.mxu3 %v2018_v13 }
 0x13d   : > { %v2118_v35 = vsel %vm915_vm15, %v2112_v34, -inf  ;;  %v2132_v14 = vsel %vm2082_vm14, %v2112_v34, -inf }
 0x13e   : > { %1255 = vmatpush.msra.mxu3 %v2021_v16  ;;  %v930_v36 = vsel %vm811_vm8, %v2118_v35, -inf  ;;  %v1023_v40 = vsel %vm811_vm8, %v2132_v14, -inf }
 0x13f   : > { %931 = vmax.xlane.f32.xlu2 %v930_v36 }
 0x140   : > { %1256 = vmatpush.msra.mxu3 %v1985_v42 }
 0x142   : > { %1257 = vmatpush.msra.mxu3 %v1982_v41 }
 0x144   : > { %1278 = vmatpush.msrb.mxu3 %v1269_v37 }
 0x146   : > { %1279 = vmatpush.msrb.mxu3 %v1268_v38 }
 0x147   : > { %1024 = vmax.xlane.f32.xlu2 %v1023_v40 }
 0x148   : > { %1280 = vmatpush.msrb.mxu3 %v1267_v39 }
 0x14a   : > { %1281 = vmatpush.msrb.mxu3 %v1266_v22 }
 0x14c   : > { %1282 = vmatpush.msrb.mxu3 %v1265_v43 }
 0x14e   : > { %1283 = vmatpush.msrb.mxu3 %v1264_v44 }
 0x150   : > { %1284 = vmatpush.msrb.mxu3 %v1263_v45 }
 0x152   : > { %1285 = vmatpush.msrb.mxu3 %v1262_v47 }
 0x15a   : > { %v897_v50 = vpop.f32.mrf.mxu0 }
 0x15b   : > { %v2149_v51 = vadd.f32 %v2070_v18, %v897_v50 }
 0x15d   : > { %v2154_v52 = vsel %vm2082_vm14, %v2149_v51, -inf  ;;  %v2159_v49 = vsel %vm915_vm15, %v2149_v51, -inf }
 0x15e   : > { %v1026_v53 = vsel %vm811_vm8, %v2154_v52, -inf  ;;  %v933_v54 = vsel %vm811_vm8, %v2159_v49, -inf }
 0x15f   : > { %1027 = vmax.xlane.f32.xlu0 %v1026_v53  ;;  %934 = vmax.xlane.f32.xlu1 %v933_v54 }
 0x162   : > { %v899_v55 = vpop.f32.mrf.mxu0 }
 0x163   : > { %v2166_v56 = vadd.f32 %v2070_v18, %v899_v55 }
 0x165   : > { %v2171_v57 = vsel %vm915_vm15, %v2166_v56, -inf  ;;  %v2176_v58 = vsel %vm2082_vm14, %v2166_v56, -inf }
 0x166   : > { %v936_v59 = vsel %vm811_vm8, %v2171_v57, -inf  ;;  %v1029_v60 = vsel %vm811_vm8, %v2176_v58, -inf }
 0x167   : > { %937 = vmax.xlane.f32.xlu2 %v936_v59  ;;  %1030 = vmax.xlane.f32.xlu1 %v1029_v60 }
 0x183   : > { %v902_v61 = vpop.f32.mrf.mxu0 }
 0x184   : > { %v2183_v62 = vadd.f32 %v2070_v18, %v902_v61 }
 0x186   : > { %v2188_v63 = vsel %vm2082_vm14, %v2183_v62, -inf  ;;  %v2193_v3 = vsel %vm915_vm15, %v2183_v62, -inf }
 0x187   : > { %v1032_v4 = vsel %vm811_vm8, %v2188_v63, -inf  ;;  %v939_v5 = vsel %vm811_vm8, %v2193_v3, -inf }
 0x188   : > { %1033 = vmax.xlane.f32.xlu1 %v1032_v4  ;;  %940 = vmax.xlane.f32.xlu2 %v939_v5 }
 0x18b   : > { %v904_v2 = vpop.f32.mrf.mxu0 }
 0x18c   : > { %v2200_v6 = vadd.f32 %v2070_v18, %v904_v2 }
 0x18e   : > { %v2205_v11 = vsel %vm915_vm15, %v2200_v6, -inf  ;;  %v2210_v7 = vsel %vm2082_vm14, %v2200_v6, -inf }
 0x18f   : > { %v942_v33 = vsel %vm811_vm8, %v2205_v11, -inf  ;;  %v1035_v9 = vsel %vm811_vm8, %v2210_v7, -inf }
 0x190   : > { %943 = vmax.xlane.f32.xlu0 %v942_v33  ;;  %1036 = vmax.xlane.f32.xlu2 %v1035_v9 }
 0x1aa   : > { %v929_v24 = vpop.xlane.xlu1 %928  ;;  %v1022_v32 = vpop.xlane.xlu0 %1021 }
 0x1ab   : > { %vm951_vm0 = vcmp.ge.f32.partialorder %v2103_v29, %v929_v24  ;;  %vm1044_vm5 = vcmp.ge.f32.partialorder %v2098_v28, %v1022_v32 }
 0x1ac   : > { %v959_v10 = vsel %vm951_vm0, -inf, %v2103_v29 }
 0x1ad   : > { %v967_v12 = vsel %vm811_vm8, %v959_v10, -inf }
 0x1ae   : > { %968 = vmax.xlane.f32.xlu0 %v967_v12  ;;  %v1122_v12 = vld [vmem:[%s2475_s4 + $0x8] sm:$0xf] }
 0x1b2   : > { %v932_v15 = vpop.xlane.xlu2 %931  ;;  %v907_v17 = vpop.f32.mrf.mxu0 }
 0x1b3   : > { %v2220_v0 = vadd.f32 %v2070_v18, %v907_v17  ;;  %vm952_vm1 = vcmp.ge.f32.partialorder %v2118_v35, %v932_v15  ;;  %v1183_v15 = vld [vmem:[%s2477_s6 + $0x8] sm:$0xf]  ;;  %v1132_v17 = vunpack.c.l.b16 %v1122_v12 }
 0x1b4   : > { %v960_v30 = vsel %vm952_vm1, -inf, %v2118_v35 }
 0x1b5   : > { %v2225_v19 = vsel %vm915_vm15, %v2220_v0, -inf  ;;  %v970_v39 = vsel %vm811_vm8, %v960_v30, -inf  ;;  %v1577_v30 = vld [vmem:[%s2475_s4] sm:$0xff] }
 0x1b6   : > { %v945_v20 = vsel %vm811_vm8, %v2225_v19, -inf }
 0x1b7   : > { %946 = vmax.xlane.f32.xlu1 %v945_v20  ;;  %v1193_v20 = vunpack.c.l.b16 %v1183_v15 }
 0x1ba   : > { %v1025_v23 = vpop.xlane.xlu2 %1024  ;;  %v909_v27 = vpop.f32.mrf.mxu0 }
 0x1bb   : > { %vm1045_vm3 = vcmp.ge.f32.partialorder %v2132_v14, %v1025_v23  ;;  %v2232_v29 = vadd.f32 %v2070_v18, %v909_v27  ;;  %v2249_v18 = vsel %vm2082_vm14, %v2220_v0, -inf  ;;  %v1134_v23 = vpack.c.b16 %v1132_v17, %v1132_v17 }
 0x1bc   : > { %v1053_v31 = vsel %vm1045_vm3, -inf, %v2132_v14  ;;  %v1052_v14 = vsel %vm1044_vm5, -inf, %v2098_v28  ;;  %v1038_v40 = vsel %vm811_vm8, %v2249_v18, -inf  ;;  %vm1148_vm3 = vcmask 1043456  }
 0x1bd   : > { %v1063_v36 = vsel %vm811_vm8, %v1053_v31, -inf  ;;  %v2240_v37 = vsel %vm915_vm15, %v2232_v29, -inf  ;;  %v2254_v35 = vsel %vm2082_vm14, %v2232_v29, -inf  ;;  %v1060_v43 = vsel %vm811_vm8, %v1052_v14, -inf  ;;  %v1578_v31 = vld [vmem:[%s2477_s6] sm:$0xff] }
 0x1be   : > { %1064 = vmax.xlane.f32.xlu0 %v1063_v36  ;;  %v948_v38 = vsel %vm811_vm8, %v2240_v37, -inf  ;;  %v1041_v22 = vsel %vm811_vm8, %v2254_v35, -inf }
 0x1bf   : > { %949 = vmax.xlane.f32.xlu2 %v948_v38  ;;  %971 = vmax.xlane.f32.xlu1 %v970_v39 }
 0x1c6   : > { %1039 = vmax.xlane.f32.xlu0 %v1038_v40 }
 0x1c7   : > { %1042 = vmax.xlane.f32.xlu1 %v1041_v22  ;;  %1061 = vmax.xlane.f32.xlu2 %v1060_v43 }
 0x1d2   : > { %v935_v44 = vpop.xlane.xlu1 %934  ;;  %v1028_v45 = vpop.xlane.xlu0 %1027 }
 0x1d3   : > { %vm953_vm6 = vcmp.ge.f32.partialorder %v2159_v49, %v935_v44  ;;  %vm1046_vm7 = vcmp.ge.f32.partialorder %v2154_v52, %v1028_v45 }
 0x1d4   : > { %v961_v47 = vsel %vm953_vm6, -inf, %v2159_v49  ;;  %v1054_v28 = vsel %vm1046_vm7, -inf, %v2154_v52 }
 0x1d5   : > { %v973_v50 = vsel %vm811_vm8, %v961_v47, -inf  ;;  %v1066_v53 = vsel %vm811_vm8, %v1054_v28, -inf }
 0x1d6   : > { %974 = vmax.xlane.f32.xlu2 %v973_v50  ;;  %1067 = vmax.xlane.f32.xlu1 %v1066_v53 }
 0x1da   : > { %v938_v54 = vpop.xlane.xlu2 %937  ;;  %v1031_v55 = vpop.xlane.xlu1 %1030 }
 0x1db   : > { %vm954_vm9 = vcmp.ge.f32.partialorder %v2171_v57, %v938_v54  ;;  %vm1047_vm10 = vcmp.ge.f32.partialorder %v2176_v58, %v1031_v55 }
 0x1dc   : > { %v962_v59 = vsel %vm954_vm9, -inf, %v2171_v57  ;;  %v1055_v60 = vsel %vm1047_vm10, -inf, %v2176_v58 }
 0x1dd   : > { %v976_v49 = vsel %vm811_vm8, %v962_v59, -inf  ;;  %v1069_v52 = vsel %vm811_vm8, %v1055_v60, -inf }
 0x1de   : > { %977 = vmax.xlane.f32.xlu0 %v976_v49  ;;  %1070 = vmax.xlane.f32.xlu2 %v1069_v52 }
 0x1fb   : > { %v1034_v61 = vpop.xlane.xlu1 %1033  ;;  %v941_v4 = vpop.xlane.xlu2 %940 }
 0x1fc   : > { %vm1048_vm12 = vcmp.ge.f32.partialorder %v2188_v63, %v1034_v61  ;;  %vm955_vm13 = vcmp.ge.f32.partialorder %v2193_v3, %v941_v4 }
 0x1fd   : > { %v963_v5 = vsel %vm955_vm13, -inf, %v2193_v3  ;;  %v1056_v2 = vsel %vm1048_vm12, -inf, %v2188_v63 }
 0x1fe   : > { %v979_v57 = vsel %vm811_vm8, %v963_v5, -inf  ;;  %v1072_v58 = vsel %vm811_vm8, %v1056_v2, -inf }
 0x1ff   : > { %980 = vmax.xlane.f32.xlu0 %v979_v57  ;;  %1073 = vmax.xlane.f32.xlu2 %v1072_v58 }
 0x203   : > { %v1037_v33 = vpop.xlane.xlu2 %1036  ;;  %v944_v9 = vpop.xlane.xlu0 %943 }
 0x204   : > { %vm1049_vm0 = vcmp.ge.f32.partialorder %v2210_v7, %v1037_v33  ;;  %vm956_vm1 = vcmp.ge.f32.partialorder %v2205_v11, %v944_v9 }
 0x205   : > { %v1057_v24 = vsel %vm1049_vm0, -inf, %v2210_v7  ;;  %v964_v10 = vsel %vm956_vm1, -inf, %v2205_v11  ;;  %v1195_v7 = vpack.c.b16 %v1193_v20, %v1193_v20  ;;  %v1150_v11 = vsel %vm1148_vm3, %v1134_v23, 0 }
 0x206   : > { %v1075_v3 = vsel %vm811_vm8, %v1057_v24, -inf  ;;  %v982_v63 = vsel %vm811_vm8, %v964_v10, -inf  ;;  %1158 = vmatpush.bf16.msra.mxu1 %v1150_v11 }
 0x207   : > { %1076 = vmax.xlane.f32.xlu0 %v1075_v3  ;;  %983 = vmax.xlane.f32.xlu1 %v982_v63  ;;  %v1198_v27 = vsel %vm1148_vm3, %v1195_v7, 0 }
 0x208   : > { %1206 = vmatpush.bf16.msra.mxu2 %v1198_v27 }
 0x20a   : > { %1159 = vmatpush.bf16.msra.mxu1 %v1577_v30 }
 0x20c   : > { %1207 = vmatpush.bf16.msra.mxu2 %v1578_v31 }
 0x221   : > { %v969_v32 = vpop.xlane.xlu0 %968 }
 0x222   : > { %vm991_vm10 = vcmp.ge.f32.partialorder %v2088_v26, %v969_v32 }
 0x223   : > { %vm2323_vm0 = vmand %vm915_vm15, %vm991_vm10 }
 0x22a   : > { %v947_v36 = vpop.xlane.xlu1 %946 }
 0x22b   : > { %vm957_vm5 = vcmp.ge.f32.partialorder %v2225_v19, %v947_v36 }
 0x22c   : > { %v965_v38 = vsel %vm957_vm5, -inf, %v2225_v19  ;;  %v1630_v19 = vld [vmem:[%s2476_s5] ss:$0 sm:$0xff] }
 0x22d   : > { %v985_v39 = vsel %vm811_vm8, %v965_v38, -inf }
 0x22e   : > { %986 = vmax.xlane.f32.xlu1 %v985_v39  ;;  %v2421_v39 = vld [vmem:[%s467_s16] sm:$0xff] }
 0x231   : > { %v1065_v14 = vpop.xlane.xlu0 %1064 }
 0x232   : > { %v950_v40 = vpop.xlane.xlu2 %949  ;;  %v972_v22 = vpop.xlane.xlu1 %971  ;;  %vm1085_vm7 = vcmp.ge.f32.partialorder %v2112_v34, %v1065_v14 }
 0x233   : > { %vm958_vm6 = vcmp.ge.f32.partialorder %v2240_v37, %v950_v40  ;;  %vm992_vm9 = vcmp.ge.f32.partialorder %v2112_v34, %v972_v22  ;;  %vm2311_vm12 = vmand %vm2082_vm14, %vm1085_vm7 }
 0x234   : > { %v966_v43 = vsel %vm958_vm6, -inf, %v2240_v37  ;;  %vm2317_vm13 = vmand %vm915_vm15, %vm992_vm9 }
 0x235   : > { %v988_v44 = vsel %vm811_vm8, %v966_v43, -inf  ;;  %vm1101_vm5 = vmor %vm2317_vm13, %vm2311_vm12 }
 0x236   : > { %989 = vmax.xlane.f32.xlu2 %v988_v44  ;;  %v1109_v60 = vsel %vm1101_vm5, %v2112_v34, 0.0 }
 0x239   : > { %v1040_v37 = vpop.xlane.xlu0 %1039 }
 0x23a   : > { %vm1050_vm1 = vcmp.ge.f32.partialorder %v2249_v18, %v1040_v37  ;;  %v1043_v28 = vpop.xlane.xlu1 %1042  ;;  %v1062_v50 = vpop.xlane.xlu2 %1061 }
 0x23b   : > { %vm1051_vm6 = vcmp.ge.f32.partialorder %v2254_v35, %v1043_v28  ;;  %vm1084_vm7 = vcmp.ge.f32.partialorder %v2088_v26, %v1062_v50  ;;  %v1058_v53 = vsel %vm1050_vm1, -inf, %v2249_v18 }
 0x23c   : > { %vm1092_vm9 = vmand %vm2082_vm14, %vm1084_vm7  ;;  %v1078_v54 = vsel %vm811_vm8, %v1058_v53, -inf  ;;  %v1059_v55 = vsel %vm1051_vm6, -inf, %v2254_v35 }
 0x23d   : > { %vm1100_vm10 = vmor %vm2323_vm0, %vm1092_vm9  ;;  %1079 = vmax.xlane.f32.xlu0 %v1078_v54  ;;  %v1081_v59 = vsel %vm811_vm8, %v1059_v55, -inf }
 0x23e   : > { %v1108_v49 = vsel %vm1100_vm10, %v2088_v26, 0.0  ;;  %1082 = vmax.xlane.f32.xlu1 %v1081_v59 }
 0x23f   : > { %v1116_v52 = vpack.c.bf16 %v1109_v60, %v1108_v49 }
 0x241   : > { %1554 = vmatmul.msk.bf16.vlgmr.msra.gmra.mxu1 %vm811_vm8, %v1116_v52  ;;  %1562 = vmatmul.msk.bf16.vlgmr.msra.gmra.mxu2 %vm811_vm8, %v1116_v52 }
 0x249   : > { %v975_v18 = vpop.xlane.xlu2 %974  ;;  %v1068_v61 = vpop.xlane.xlu1 %1067 }
 0x24a   : > { %vm993_vm12 = vcmp.ge.f32.partialorder %v2149_v51, %v975_v18  ;;  %vm1086_vm13 = vcmp.ge.f32.partialorder %v2149_v51, %v1068_v61 }
 0x24b   : > { %vm1001_vm0 = vmand %vm915_vm15, %vm993_vm12 }
 0x24c   : > { %vm1094_vm1 = vmand %vm2082_vm14, %vm1086_vm13 }
 0x24d   : > { %vm1102_vm5 = vmor %vm1001_vm0, %vm1094_vm1 }
 0x24e   : > { %v1110_v35 = vsel %vm1102_vm5, %v2149_v51, 0.0 }
 0x251   : > { %v1071_v34 = vpop.xlane.xlu2 %1070  ;;  %v978_v26 = vpop.xlane.xlu0 %977 }
 0x252   : > { %vm1087_vm6 = vcmp.ge.f32.partialorder %v2166_v56, %v1071_v34  ;;  %vm994_vm7 = vcmp.ge.f32.partialorder %v2166_v56, %v978_v26 }
 0x253   : > { %vm1095_vm9 = vmand %vm2082_vm14, %vm1087_vm6 }
 0x254   : > { %vm1002_vm10 = vmand %vm915_vm15, %vm994_vm7 }
 0x255   : > { %vm1103_vm11 = vmor %vm1002_vm10, %vm1095_vm9 }
 0x256   : > { %v1111_v4 = vsel %vm1103_vm11, %v2166_v56, 0.0 }
 0x257   : > { %v1117_v5 = vpack.c.bf16 %v1111_v4, %v1110_v35 }
 0x259   : > { %1555 = vmatmul.msk.bf16.gmra.mxu1 %vm811_vm8, %v1117_v5  ;;  %1563 = vmatmul.msk.bf16.gmra.mxu2 %vm811_vm8, %v1117_v5 }
 0x272   : > { %v1074_v2 = vpop.xlane.xlu2 %1073  ;;  %v981_v57 = vpop.xlane.xlu0 %980 }
 0x273   : > { %vm1088_vm12 = vcmp.ge.f32.partialorder %v2183_v62, %v1074_v2  ;;  %vm995_vm13 = vcmp.ge.f32.partialorder %v2183_v62, %v981_v57 }
 0x274   : > { %vm1096_vm0 = vmand %vm2082_vm14, %vm1088_vm12 }
 0x275   : > { %vm1003_vm1 = vmand %vm915_vm15, %vm995_vm13 }
 0x276   : > { %vm1104_vm11 = vmor %vm1003_vm1, %vm1096_vm0 }
 0x277   : > { %v1112_v56 = vsel %vm1104_vm11, %v2183_v62, 0.0 }
 0x27a   : > { %v984_v51 = vpop.xlane.xlu1 %983  ;;  %v1077_v58 = vpop.xlane.xlu0 %1076 }
 0x27b   : > { %vm996_vm5 = vcmp.ge.f32.partialorder %v2200_v6, %v984_v51  ;;  %vm1089_vm6 = vcmp.ge.f32.partialorder %v2200_v6, %v1077_v58 }
 0x27c   : > { %vm1004_vm7 = vmand %vm915_vm15, %vm996_vm5 }
 0x27d   : > { %vm1097_vm9 = vmand %vm2082_vm14, %vm1089_vm6 }
 0x27e   : > { %vm1105_vm10 = vmor %vm1004_vm7, %vm1097_vm9 }
 0x27f   : > { %v1113_v33 = vsel %vm1105_vm10, %v2200_v6, 0.0 }
 0x280   : > { %v1118_v9 = vpack.c.bf16 %v1113_v33, %v1112_v56 }
 0x282   : > { %1556 = vmatmul.msk.bf16.gmra.mxu1 %vm811_vm8, %v1118_v9  ;;  %1564 = vmatmul.msk.bf16.gmra.mxu2 %vm811_vm8, %v1118_v9 }
 0x2a1   : > { %v987_v24 = vpop.xlane.xlu1 %986 }
 0x2a2   : > { %vm997_vm12 = vcmp.ge.f32.partialorder %v2220_v0, %v987_v24 }
 0x2a3   : > { %vm1005_vm0 = vmand %vm915_vm15, %vm997_vm12 }
 0x2a9   : > { %v990_v10 = vpop.xlane.xlu2 %989 }
 0x2aa   : > { %vm998_vm13 = vcmp.ge.f32.partialorder %v2232_v29, %v990_v10 }
 0x2ab   : > { %vm1006_vm1 = vmand %vm915_vm15, %vm998_vm13  ;;  %vm1384_vm15 = vcmask 1044480  }
 0x2b0   : > { %v1080_v3 = vpop.xlane.xlu0 %1079 }
 0x2b1   : > { %vm1090_vm11 = vcmp.ge.f32.partialorder %v2220_v0, %v1080_v3  ;;  %v1083_v62 = vpop.xlane.xlu1 %1082 }
 0x2b2   : > { %vm1098_vm5 = vmand %vm2082_vm14, %vm1090_vm11  ;;  %vm1091_vm6 = vcmp.ge.f32.partialorder %v2232_v29, %v1083_v62 }
 0x2b3   : > { %vm1106_vm7 = vmor %vm1005_vm0, %vm1098_vm5 }
 0x2b4   : > { %v1114_v6 = vsel %vm1106_vm7, %v2220_v0, 0.0  ;;  %vm1099_vm9 = vmand %vm2082_vm14, %vm1091_vm6  ;;  %vm1381_vm14 = vcmask 1042432  }
 0x2b5   : > { %vm1107_vm10 = vmor %vm1006_vm1, %vm1099_vm9 }
 0x2b6   : > { %v1115_v63 = vsel %vm1107_vm10, %v2232_v29, 0.0 }
 0x2b7   : > { %v1119_v12 = vpack.c.bf16 %v1115_v63, %v1114_v6 }
 0x2b9   : > { %1557 = vmatmul.msk.bf16.gmra.mxu1 %vm811_vm8, %v1119_v12  ;;  %1565 = vmatmul.msk.bf16.gmra.mxu2 %vm811_vm8, %v1119_v12  ;;  %vm1238_vm8 = vcmask 523264  }
 0x2ba   : > { %1566 = vmatmul.msk.f32.vlgmr.msra.gmra.mxu3 %vm1238_vm8, %v2421_v39 }
 0x2be   : > { %v1161_v11 = vpop.f32.mrf.mxu1 }
 0x2c2   : > { %1567 = vmatmul.msk.f32.vlgmr.msrb.gmra.mxu3 %vm1238_vm8, %v2421_v39 }
 0x2c4   : > { %v1209_v25 = vpop.f32.mrf.mxu2 }
 0x2c5   : > { %v1210_v0 = vadd.f32 %v1631_v8, %v1209_v25 }
 0x2c6   : > { %v1163_v31 = vpop.f32.mrf.mxu1 }
 0x2c7   : > { %1229 = vst.msk [vmem:[%s2401_s26] sm:$0xff] %vm775_vm4, %v1210_v0 }
 0x2cc   : > { %v1211_v29 = vpop.f32.mrf.mxu2 }
 0x2cd   : > { %v1212_v15 = vadd.f32 %v1631_v8, %v1211_v29 }
 0x2cf   : > { %1230 = vst.msk [vmem:[%s2401_s26 + $0x8] sm:$0xff] %vm775_vm4, %v1212_v15 }
 0x2d6   : > { %v1166_v38 = vpop.f32.mrf.mxu1 }
 0x2d7   : > { %v1167_v18 = vadd.f32 %v1630_v19, %v1166_v38 }
 0x2d9   : > { %v1340_v26 = vmul.f32 %v1167_v18, %v2021_v16  ;;  %v1312_v5 = vmul.f32 %v1167_v18, %v1167_v18 }
 0x2dc   : > { %v1214_v17 = vpop.f32.mrf.mxu2 }
 0x2dd   : > { %v1215_v20 = vadd.f32 %v1631_v8, %v1214_v17 }
 0x2de   : > { %v1168_v14 = vpop.f32.mrf.mxu1 }
 0x2df   : > { %1231 = vst.msk [vmem:[%s2401_s26 + $0x10] sm:$0xff] %vm775_vm4, %v1215_v20  ;;  %v1169_v60 = vadd.f32 %v1630_v19, %v1168_v14 }
 0x2e1   : > { %v1341_v34 = vmul.f32 %v1169_v60, %v2018_v13 }
 0x2e4   : > { %v1216_v23 = vpop.f32.mrf.mxu2 }
 0x2e5   : > { %v1217_v7 = vadd.f32 %v1631_v8, %v1216_v23 }
 0x2e7   : > { %1232 = vst.msk [vmem:[%s2401_s26 + $0x18] sm:$0xff] %vm775_vm4, %v1217_v7 }
 0x2ff   : > { %v1171_v40 = vpop.f32.mrf.mxu1 }
 0x300   : > { %v1172_v54 = vadd.f32 %v1630_v19, %v1171_v40 }
 0x302   : > { %v1342_v61 = vmul.f32 %v1172_v54, %v2042_v46  ;;  %v1314_v16 = vmul.f32 %v1172_v54, %v1172_v54 }
 0x305   : > { %v1219_v27 = vpop.f32.mrf.mxu2 }
 0x306   : > { %v1220_v30 = vadd.f32 %v1631_v8, %v1219_v27 }
 0x307   : > { %v1173_v22 = vpop.f32.mrf.mxu1 }
 0x308   : > { %1233 = vst.msk [vmem:[%s2401_s26 + $0x20] sm:$0xff] %vm775_vm4, %v1220_v30  ;;  %v1174_v50 = vadd.f32 %v1630_v19, %v1173_v22 }
 0x30a   : > { %v1343_v52 = vmul.f32 %v1174_v50, %v2046_v48  ;;  %v1315_v13 = vmul.f32 %v1174_v50, %v1174_v50 }
 0x30d   : > { %v1221_v32 = vpop.f32.mrf.mxu2 }
 0x30e   : > { %v1222_v36 = vadd.f32 %v1631_v8, %v1221_v32 }
 0x310   : > { %1234 = vst.msk [vmem:[%s2401_s26 + $0x28] sm:$0xff] %vm775_vm4, %v1222_v36 }
 0x336   : > { %v1176_v43 = vpop.f32.mrf.mxu1 }
 0x337   : > { %v1177_v47 = vadd.f32 %v1630_v19, %v1176_v43 }
 0x339   : > { %v1344_v55 = vmul.f32 %v1177_v47, %v2077_v21  ;;  %v1162_v21 = vadd.f32 %v1630_v19, %v1161_v11  ;;  %v1316_v46 = vmul.f32 %v1177_v47, %v1177_v47 }
 0x33b   : > { %v1338_v4 = vmul.f32 %v1162_v21, %v1982_v41  ;;  %v1310_v41 = vmul.f32 %v1162_v21, %v1162_v21 }
 0x33c   : > { %v1224_v44 = vpop.f32.mrf.mxu2 }
 0x33d   : > { %v1225_v45 = vadd.f32 %v1631_v8, %v1224_v44  ;;  %v1259_v57 = vpop.f32.mrf.mxu3 }
 0x33e   : > { %v1178_v37 = vpop.f32.mrf.mxu1 }
 0x33f   : > { %1235 = vst.msk [vmem:[%s2401_s26 + $0x30] sm:$0xff] %vm775_vm4, %v1225_v45  ;;  %v1179_v28 = vadd.f32 %v1630_v19, %v1178_v37 }
 0x341   : > { %1298 = vmatpush.msra.mxu3 %v1179_v28  ;;  %v1345_v53 = vmul.f32 %v1179_v28, %v2080_v1  ;;  %v1164_v1 = vadd.f32 %v1630_v19, %v1163_v31  ;;  %v1317_v35 = vmul.f32 %v1179_v28, %v1179_v28 }
 0x343   : > { %1299 = vmatpush.msra.mxu3 %v1177_v47  ;;  %1354 = vmatpush.msrb.mxu1 %v1345_v53  ;;  %v1339_v48 = vmul.f32 %v1164_v1, %v1985_v42  ;;  %v1313_v42 = vmul.f32 %v1169_v60, %v1169_v60  ;;  %v1311_v2 = vmul.f32 %v1164_v1, %v1164_v1 }
 0x344   : > { %v1226_v59 = vpop.f32.mrf.mxu2 }
 0x345   : > { %v1227_v49 = vadd.f32 %v1631_v8, %v1226_v59  ;;  %1300 = vmatpush.msra.mxu3 %v1174_v50  ;;  %1355 = vmatpush.msrb.mxu1 %v1344_v55  ;;  %v1287_v51 = vpop.f32.mrf.mxu3 }
 0x346   : > { %v1367_v56 = vrot.slane %v1287_v51, 7 }
 0x347   : > { %1236 = vst.msk [vmem:[%s2401_s26 + $0x38] sm:$0xff] %vm775_vm4, %v1227_v49  ;;  %1301 = vmatpush.msra.mxu3 %v1172_v54  ;;  %1356 = vmatpush.msrb.mxu1 %v1343_v52  ;;  %vm1378_vm4 = vcmask 1040384  }
 0x348   : > { %v1379_v3 = vsel %vm1378_vm4, %v1259_v57, %v1367_v56 }
 0x349   : > { %1302 = vmatpush.msra.mxu3 %v1169_v60  ;;  %1357 = vmatpush.msrb.mxu1 %v1342_v61 }
 0x34b   : > { %1303 = vmatpush.msra.mxu3 %v1167_v18  ;;  %1358 = vmatpush.msrb.mxu1 %v1341_v34 }
 0x34d   : > { %1304 = vmatpush.msra.mxu3 %v1164_v1  ;;  %1359 = vmatpush.msrb.mxu1 %v1340_v26 }
 0x34f   : > { %1305 = vmatpush.msra.mxu3 %v1162_v21  ;;  %1360 = vmatpush.msrb.mxu1 %v1339_v48 }
 0x350   : > { %1568 = vmatmul.msk.f32.vlgmr.msra.gmra.mxu3 %vm1238_vm8, %v2421_v39 }
 0x351   : > { %1326 = vmatpush.msrb.mxu3 %v1317_v35  ;;  %1361 = vmatpush.msrb.mxu1 %v1338_v4 }
 0x352   : > { %1570 = vmatmul.msk.f32.vlgmr.msrb.gmra.mxu1 %vm1238_vm8, %v2421_v39 }
 0x353   : > { %1327 = vmatpush.msrb.mxu3 %v1316_v46 }
 0x355   : > { %1328 = vmatpush.msrb.mxu3 %v1315_v13 }
 0x357   : > { %1329 = vmatpush.msrb.mxu3 %v1314_v16 }
 0x359   : > { %1330 = vmatpush.msrb.mxu3 %v1313_v42 }
 0x35b   : > { %1331 = vmatpush.msrb.mxu3 %v1312_v5 }
 0x35d   : > { %1332 = vmatpush.msrb.mxu3 %v1311_v2 }
 0x35f   : > { %1333 = vmatpush.msrb.mxu3 %v1310_v41 }
 0x360   : > { %1569 = vmatmul.msk.f32.vlgmr.msrb.gmra.mxu3 %vm1238_vm8, %v2421_v39 }
 0x3cf   : > { %v1363_v33 = vpop.f32.mrf.mxu1 }
 0x3d0   : > { %v1376_v10 = vrot.slane %v1363_v33, 4 }
 0x3d3   : > { %v1307_v58 = vpop.f32.mrf.mxu3 }
 0x3d4   : > { %v1370_v9 = vrot.slane %v1307_v58, 6 }
 0x3d6   : > { %v1380_v6 = vsel %vm879_vm2, %v1379_v3, %v1370_v9 }
 0x3e3   : > { %v1335_v24 = vpop.f32.mrf.mxu3 }
 0x3e4   : > { %v1373_v62 = vrot.slane %v1335_v24, 5  ;;  %1389 = sbr.rel (%p1571_p10) target bundleno = 1003 (0x3eb), region = 56 }
 0x3e6   : > { %v1382_v63 = vsel %vm1381_vm14, %v1380_v6, %v1373_v62 }
 0x3e7   : > { %v1383_v12 = vsel %vm1148_vm3, %v1382_v63, %v1376_v10 }
 0x3e8   : > { %v1385_v8 = vsel %vm1384_vm15, %v1383_v12, 0.0 }
 0x3e9   : > { %v1680_v25 = vmov 0.0   ;;  %vm2493_vm12 = vcmask 293888  }
 0x3ea   : > { %1390 = vst.msk [vmem:[%s1840_s20] sm:$0xff] %vm2493_vm12, %v1680_v25 }
 0x3eb PF: > { %vm2494_vm13 = vcmask 293888  }
 0x3f1   : > { %v1391_v0 = vld [vmem:[%s1840_s20] sm:$0xff] }
 0x3f2   : > { %v1392_v29 = vadd.f32 %v1391_v0, %v1385_v8 }
 0x3f4   : > { %1393 = vst.msk [vmem:[%s1840_s20] sm:$0xff] %vm2494_vm13, %v1392_v29 }
 0x3f5 PF: > { %s20_s13 = sadd.s32 1, %s1670_s13   ;;  %s2495_s30 = smov %s1662_s11 }
 0x3f6   : > { %p17_p11 = scmp.ge.s32.totalorder %s20_s13, 10   ;;  %s2496_s10 = smov %s1666_s12 }
 0x3f7   : > { %s2497_s11 = smov %s2500_s14  ;;  %s2498_s12 = smov %s2504_s15 }
 0x3f8   :  { %19 = sbr.rel (!%p17_p11) target bundleno = 3 (0x3), region = 101 }

</bundles_post_ra>
